<compile_context>
chip_gen: v5e
topology: v5e:2x2
jax: 0.10.0
libtpu: 0.0.40
codegen_flags: <defaults>
</compile_context>

<pallas_src>
import functools

import jax
import jax.numpy as jnp
from jax.experimental import pallas as pl
from jax.experimental.pallas import tpu as pltpu


def _upsample_kernel(x_ref, w_ref, b_ref, s_ref, o_ref, *, C, H, W, F):
    """Fused 1x1 conv (+bias) and PixelShuffle for one batch element.

    x_ref: (1, Cin, H*W)          input, spatial flattened on lanes
    w_ref: (F*F*C, Cin)           weight rows ordered (i, j, c)
    b_ref: (F*F*C, 1)             bias, same ordering
    s_ref: (F, W, W*F)            constant placement matrices S[j,w,w*F+j]=1
    o_ref: (1, C, H*F*W*F)        flat, lane-dense output
    """
    x = x_ref[0]                                          # (Cin, H*W)

    # Single fused MXU matmul for the whole 1x1 conv, f32 accumulation.
    y = jnp.dot(w_ref[...], x,
                preferred_element_type=jnp.float32) + b_ref[...]
    # y: (F*F*C, H*W); rows grouped by (i, j) with c innermost.

    WF = W * F
    for h in range(H):                                    # static unroll
        y_h = y[:, h * W:(h + 1) * W]                     # (F*F*C, W)
        for i in range(F):
            # Output row h*F + i: interleave the F channel groups (i, j, :)
            # along W via constant placement matmuls (lane scatter on MXU).
            g0 = (i * F) * C
            row = jnp.dot(y_h[g0:g0 + C, :], s_ref[0],
                          preferred_element_type=jnp.float32)   # (C, W*F)
            for j in range(1, F):
                g = (i * F + j) * C
                row = row + jnp.dot(y_h[g:g + C, :], s_ref[j],
                                    preferred_element_type=jnp.float32)
            start = (h * F + i) * WF
            o_ref[0, :, pl.ds(start, WF)] = row


def upsample(x_nchw, weight_oihw, bias, *, factor=2):
    """UpSample forward: y = PixelShuffle(factor)(Conv2d_1x1(x))."""
    N, Cin, H, W = x_nchw.shape
    Cout = weight_oihw.shape[0]
    F = factor
    C = Cout // (F * F)
    assert C * F * F == Cout
    assert weight_oihw.shape == (Cout, Cin, 1, 1)

    x = x_nchw.reshape(N, Cin, H * W).astype(jnp.float32)          # free

    # Reorder conv weight/bias so output-channel rows are ordered (i, j, c):
    # original out-channel o = c*F*F + i*F + j  ->  row (i*F + j)*C + c.
    w_r = jnp.transpose(
        weight_oihw.reshape(C, F, F, Cin).astype(jnp.float32),
        (1, 2, 0, 3)).reshape(F * F * C, Cin)
    b_r = jnp.transpose(
        bias.reshape(C, F, F).astype(jnp.float32),
        (1, 2, 0)).reshape(F * F * C, 1)

    # Constant lane-placement matrices: S[j, w, w*F + j] = 1.
    lane = jnp.arange(W * F)
    S = (lane[None, None, :] ==
         (jnp.arange(W)[None, :, None] * F +
          jnp.arange(F)[:, None, None])).astype(jnp.float32)       # (F, W, W*F)

    kernel = functools.partial(_upsample_kernel, C=C, H=H, W=W, F=F)

    out_flat = pl.pallas_call(
        kernel,
        out_shape=jax.ShapeDtypeStruct((N, C, H * F * W * F), jnp.float32),
        grid=(N,),
        in_specs=[
            pl.BlockSpec((1, Cin, H * W), lambda n: (n, 0, 0)),
            pl.BlockSpec((F * F * C, Cin), lambda n: (0, 0)),
            pl.BlockSpec((F * F * C, 1), lambda n: (0, 0)),
            pl.BlockSpec((F, W, W * F), lambda n: (0, 0, 0)),
        ],
        out_specs=pl.BlockSpec((1, C, H * F * W * F), lambda n: (n, 0, 0)),
        compiler_params=pltpu.CompilerParams(
            dimension_semantics=("parallel",)),
    )(x, w_r, b_r, S)

    return out_flat.reshape(N, C, H * F, W * F)                    # free


def _reference(x_nchw, weight_oihw, bias, factor):
    """Pure-JAX reference: 1x1 conv + PixelShuffle."""
    N, Cin, H, W = x_nchw.shape
    Cout = weight_oihw.shape[0]
    w2 = weight_oihw.reshape(Cout, Cin).astype(jnp.float32)
    y = jnp.einsum('nchw,oc->nohw', x_nchw.astype(jnp.float32), w2,
                   precision=jax.lax.Precision.HIGHEST)
    y = y + bias.reshape(1, Cout, 1, 1).astype(jnp.float32)
    C = Cout // (factor * factor)
    y = y.reshape(N, C, factor, factor, H, W)
    y = jnp.transpose(y, (0, 1, 4, 2, 5, 3))
    return y.reshape(N, C, H * factor, W * factor)


if __name__ == "__main__":
    key = jax.random.PRNGKey(0)
    k_x, k_w, k_b = jax.random.split(key, 3)

    N, Cin, H, W = 2, 4, 16, 16
    factor = 2
    Cout = Cin * factor * factor          # proj: in_channel -> in_channel*f*f

    x = jax.random.normal(k_x, (N, Cin, H, W), dtype=jnp.float32)

    # xavier_normal_(gain=1): std = sqrt(2 / (fan_in + fan_out)), 1x1 kernel.
    std = jnp.sqrt(jnp.float32(2.0 / (Cin + Cout)))
    weight = jax.random.normal(k_w, (Cout, Cin, 1, 1), dtype=jnp.float32) * std
    # Conv2d default bias init: U(-1/sqrt(fan_in), 1/sqrt(fan_in)).
    bound = 1.0 / jnp.sqrt(jnp.float32(Cin))
    bias = jax.random.uniform(k_b, (Cout,), dtype=jnp.float32,
                              minval=-bound, maxval=bound)

    out = upsample(x, weight, bias, factor=factor)
    out = jax.block_until_ready(out)

    ref = _reference(x, weight, bias, factor)
    assert out.shape == (N, Cin, H * factor, W * factor)
    assert jnp.allclose(out, ref, atol=1e-4, rtol=1e-4)

    print("KERNEL_OK")
</pallas_src>

<mosaic_0001>
module attributes {stable_mosaic.version = 11 : i64} {
  func.func @_upsample_kernel(%arg0: i32, %arg1: memref<1x4x256xf32, #tpu.memory_space<vmem>>, %arg2: memref<16x4xf32, #tpu.memory_space<vmem>>, %arg3: memref<16x1xf32, #tpu.memory_space<vmem>>, %arg4: memref<2x16x32xf32, #tpu.memory_space<vmem>>, %arg5: memref<1x4x1024xf32, #tpu.memory_space<vmem>>) attributes {dimension_semantics = [#tpu.dimension_semantics<parallel>], iteration_bounds = array<i64: 2>, scalar_prefetch = 0 : i64, scratch_operands = 0 : i64, tpu.core_type = #tpu.core_type<tc>, window_params = [{transform_indices = @transform_0, window_bounds = array<i64: 1, 4, 256>}, {pipeline_mode = #tpu.pipeline_mode<synchronous>, transform_indices = @transform_1, window_bounds = array<i64: 16, 4>}, {pipeline_mode = #tpu.pipeline_mode<synchronous>, transform_indices = @transform_2, window_bounds = array<i64: 16, 1>}, {pipeline_mode = #tpu.pipeline_mode<synchronous>, transform_indices = @transform_3, window_bounds = array<i64: 2, 16, 32>}, {transform_indices = @transform_4, window_bounds = array<i64: 1, 4, 1024>}]} {
    %c0 = arith.constant 0 : index
    %c0_0 = arith.constant 0 : index
    %c0_1 = arith.constant 0 : index
    %0 = vector.load %arg1[%c0, %c0_0, %c0_1] : memref<1x4x256xf32, #tpu.memory_space<vmem>>, vector<1x4x256xf32>
    %1 = vector.shape_cast %0 : vector<1x4x256xf32> to vector<4x256xf32>
    %c0_2 = arith.constant 0 : index
    %c0_3 = arith.constant 0 : index
    %2 = vector.load %arg2[%c0_2, %c0_3] : memref<16x4xf32, #tpu.memory_space<vmem>>, vector<16x4xf32>
    %cst = arith.constant dense<0.000000e+00> : vector<16x256xf32>
    %3 = tpu.matmul %2, %1, %cst {dimension_numbers = #tpu.dot_dimension_numbers<[1], [0], [0], [1], [0, 0, 1, 1], [], []>} : vector<16x4xf32>, vector<4x256xf32>, vector<16x256xf32> -> vector<16x256xf32>
    %c0_4 = arith.constant 0 : index
    %c0_5 = arith.constant 0 : index
    %4 = vector.load %arg3[%c0_4, %c0_5] : memref<16x1xf32, #tpu.memory_space<vmem>>, vector<16x1xf32>
    %5 = vector.broadcast %4 : vector<16x1xf32> to vector<16x256xf32>
    %6 = arith.addf %3, %5 : vector<16x256xf32>
    %7 = vector.extract_strided_slice %6 {offsets = [0, 0], sizes = [16, 16], strides = [1, 1]} : vector<16x256xf32> to vector<16x16xf32>
    %8 = vector.extract_strided_slice %7 {offsets = [0, 0], sizes = [4, 16], strides = [1, 1]} : vector<16x16xf32> to vector<4x16xf32>
    %c0_6 = arith.constant 0 : index
    %c0_7 = arith.constant 0 : index
    %c0_8 = arith.constant 0 : index
    %9 = vector.load %arg4[%c0_6, %c0_7, %c0_8] : memref<2x16x32xf32, #tpu.memory_space<vmem>>, vector<1x16x32xf32>
    %10 = vector.shape_cast %9 : vector<1x16x32xf32> to vector<16x32xf32>
    %cst_9 = arith.constant dense<0.000000e+00> : vector<4x32xf32>
    %11 = tpu.matmul %8, %10, %cst_9 {dimension_numbers = #tpu.dot_dimension_numbers<[1], [0], [0], [1], [0, 0, 1, 1], [], []>} : vector<4x16xf32>, vector<16x32xf32>, vector<4x32xf32> -> vector<4x32xf32>
    %12 = vector.extract_strided_slice %7 {offsets = [4, 0], sizes = [4, 16], strides = [1, 1]} : vector<16x16xf32> to vector<4x16xf32>
    %c1 = arith.constant 1 : index
    %c0_10 = arith.constant 0 : index
    %c0_11 = arith.constant 0 : index
    %13 = vector.load %arg4[%c1, %c0_10, %c0_11] : memref<2x16x32xf32, #tpu.memory_space<vmem>>, vector<1x16x32xf32>
    %14 = vector.shape_cast %13 : vector<1x16x32xf32> to vector<16x32xf32>
    %cst_12 = arith.constant dense<0.000000e+00> : vector<4x32xf32>
    %15 = tpu.matmul %12, %14, %cst_12 {dimension_numbers = #tpu.dot_dimension_numbers<[1], [0], [0], [1], [0, 0, 1, 1], [], []>} : vector<4x16xf32>, vector<16x32xf32>, vector<4x32xf32> -> vector<4x32xf32>
    %16 = arith.addf %11, %15 : vector<4x32xf32>
    %c0_13 = arith.constant 0 : index
    %c0_14 = arith.constant 0 : index
    %c0_15 = arith.constant 0 : index
    %17 = vector.load %arg5[%c0_13, %c0_14, %c0_15] : memref<1x4x1024xf32, #tpu.memory_space<vmem>>, vector<1x4x32xf32>
    %18 = vector.shape_cast %17 : vector<1x4x32xf32> to vector<4x32xf32>
    %19 = vector.shape_cast %16 : vector<4x32xf32> to vector<1x4x32xf32>
    tpu.vector_store %arg5[%c0_13, %c0_14, %c0_15], %19 {strides = array<i32>} : memref<1x4x1024xf32, #tpu.memory_space<vmem>>, vector<1x4x32xf32>,
    %20 = vector.extract_strided_slice %7 {offsets = [8, 0], sizes = [4, 16], strides = [1, 1]} : vector<16x16xf32> to vector<4x16xf32>
    %c0_16 = arith.constant 0 : index
    %c0_17 = arith.constant 0 : index
    %c0_18 = arith.constant 0 : index
    %21 = vector.load %arg4[%c0_16, %c0_17, %c0_18] : memref<2x16x32xf32, #tpu.memory_space<vmem>>, vector<1x16x32xf32>
    %22 = vector.shape_cast %21 : vector<1x16x32xf32> to vector<16x32xf32>
    %cst_19 = arith.constant dense<0.000000e+00> : vector<4x32xf32>
    %23 = tpu.matmul %20, %22, %cst_19 {dimension_numbers = #tpu.dot_dimension_numbers<[1], [0], [0], [1], [0, 0, 1, 1], [], []>} : vector<4x16xf32>, vector<16x32xf32>, vector<4x32xf32> -> vector<4x32xf32>
    %24 = vector.extract_strided_slice %7 {offsets = [12, 0], sizes = [4, 16], strides = [1, 1]} : vector<16x16xf32> to vector<4x16xf32>
    %c1_20 = arith.constant 1 : index
    %c0_21 = arith.constant 0 : index
    %c0_22 = arith.constant 0 : index
    %25 = vector.load %arg4[%c1_20, %c0_21, %c0_22] : memref<2x16x32xf32, #tpu.memory_space<vmem>>, vector<1x16x32xf32>
    %26 = vector.shape_cast %25 : vector<1x16x32xf32> to vector<16x32xf32>
    %cst_23 = arith.constant dense<0.000000e+00> : vector<4x32xf32>
    %27 = tpu.matmul %24, %26, %cst_23 {dimension_numbers = #tpu.dot_dimension_numbers<[1], [0], [0], [1], [0, 0, 1, 1], [], []>} : vector<4x16xf32>, vector<16x32xf32>, vector<4x32xf32> -> vector<4x32xf32>
    %28 = arith.addf %23, %27 : vector<4x32xf32>
    %c0_24 = arith.constant 0 : index
    %c0_25 = arith.constant 0 : index
    %c32 = arith.constant 32 : index
    %29 = vector.load %arg5[%c0_24, %c0_25, %c32] : memref<1x4x1024xf32, #tpu.memory_space<vmem>>, vector<1x4x32xf32>
    %30 = vector.shape_cast %29 : vector<1x4x32xf32> to vector<4x32xf32>
    %31 = vector.shape_cast %28 : vector<4x32xf32> to vector<1x4x32xf32>
    tpu.vector_store %arg5[%c0_24, %c0_25, %c32], %31 {strides = array<i32>} : memref<1x4x1024xf32, #tpu.memory_space<vmem>>, vector<1x4x32xf32>,
    %32 = vector.extract_strided_slice %6 {offsets = [0, 16], sizes = [16, 16], strides = [1, 1]} : vector<16x256xf32> to vector<16x16xf32>
    %33 = vector.extract_strided_slice %32 {offsets = [0, 0], sizes = [4, 16], strides = [1, 1]} : vector<16x16xf32> to vector<4x16xf32>
    %c0_26 = arith.constant 0 : index
    %c0_27 = arith.constant 0 : index
    %c0_28 = arith.constant 0 : index
    %34 = vector.load %arg4[%c0_26, %c0_27, %c0_28] : memref<2x16x32xf32, #tpu.memory_space<vmem>>, vector<1x16x32xf32>
    %35 = vector.shape_cast %34 : vector<1x16x32xf32> to vector<16x32xf32>
    %cst_29 = arith.constant dense<0.000000e+00> : vector<4x32xf32>
    %36 = tpu.matmul %33, %35, %cst_29 {dimension_numbers = #tpu.dot_dimension_numbers<[1], [0], [0], [1], [0, 0, 1, 1], [], []>} : vector<4x16xf32>, vector<16x32xf32>, vector<4x32xf32> -> vector<4x32xf32>
    %37 = vector.extract_strided_slice %32 {offsets = [4, 0], sizes = [4, 16], strides = [1, 1]} : vector<16x16xf32> to vector<4x16xf32>
    %c1_30 = arith.constant 1 : index
    %c0_31 = arith.constant 0 : index
    %c0_32 = arith.constant 0 : index
    %38 = vector.load %arg4[%c1_30, %c0_31, %c0_32] : memref<2x16x32xf32, #tpu.memory_space<vmem>>, vector<1x16x32xf32>
    %39 = vector.shape_cast %38 : vector<1x16x32xf32> to vector<16x32xf32>
    %cst_33 = arith.constant dense<0.000000e+00> : vector<4x32xf32>
    %40 = tpu.matmul %37, %39, %cst_33 {dimension_numbers = #tpu.dot_dimension_numbers<[1], [0], [0], [1], [0, 0, 1, 1], [], []>} : vector<4x16xf32>, vector<16x32xf32>, vector<4x32xf32> -> vector<4x32xf32>
    %41 = arith.addf %36, %40 : vector<4x32xf32>
    %c0_34 = arith.constant 0 : index
    %c0_35 = arith.constant 0 : index
    %c64 = arith.constant 64 : index
    %42 = vector.load %arg5[%c0_34, %c0_35, %c64] : memref<1x4x1024xf32, #tpu.memory_space<vmem>>, vector<1x4x32xf32>
    %43 = vector.shape_cast %42 : vector<1x4x32xf32> to vector<4x32xf32>
    %44 = vector.shape_cast %41 : vector<4x32xf32> to vector<1x4x32xf32>
    tpu.vector_store %arg5[%c0_34, %c0_35, %c64], %44 {strides = array<i32>} : memref<1x4x1024xf32, #tpu.memory_space<vmem>>, vector<1x4x32xf32>,
    %45 = vector.extract_strided_slice %32 {offsets = [8, 0], sizes = [4, 16], strides = [1, 1]} : vector<16x16xf32> to vector<4x16xf32>
    %c0_36 = arith.constant 0 : index
    %c0_37 = arith.constant 0 : index
    %c0_38 = arith.constant 0 : index
    %46 = vector.load %arg4[%c0_36, %c0_37, %c0_38] : memref<2x16x32xf32, #tpu.memory_space<vmem>>, vector<1x16x32xf32>
    %47 = vector.shape_cast %46 : vector<1x16x32xf32> to vector<16x32xf32>
    %cst_39 = arith.constant dense<0.000000e+00> : vector<4x32xf32>
    %48 = tpu.matmul %45, %47, %cst_39 {dimension_numbers = #tpu.dot_dimension_numbers<[1], [0], [0], [1], [0, 0, 1, 1], [], []>} : vector<4x16xf32>, vector<16x32xf32>, vector<4x32xf32> -> vector<4x32xf32>
    %49 = vector.extract_strided_slice %32 {offsets = [12, 0], sizes = [4, 16], strides = [1, 1]} : vector<16x16xf32> to vector<4x16xf32>
    %c1_40 = arith.constant 1 : index
    %c0_41 = arith.constant 0 : index
    %c0_42 = arith.constant 0 : index
    %50 = vector.load %arg4[%c1_40, %c0_41, %c0_42] : memref<2x16x32xf32, #tpu.memory_space<vmem>>, vector<1x16x32xf32>
    %51 = vector.shape_cast %50 : vector<1x16x32xf32> to vector<16x32xf32>
    %cst_43 = arith.constant dense<0.000000e+00> : vector<4x32xf32>
    %52 = tpu.matmul %49, %51, %cst_43 {dimension_numbers = #tpu.dot_dimension_numbers<[1], [0], [0], [1], [0, 0, 1, 1], [], []>} : vector<4x16xf32>, vector<16x32xf32>, vector<4x32xf32> -> vector<4x32xf32>
    %53 = arith.addf %48, %52 : vector<4x32xf32>
    %c0_44 = arith.constant 0 : index
    %c0_45 = arith.constant 0 : index
    %c96 = arith.constant 96 : index
    %54 = vector.load %arg5[%c0_44, %c0_45, %c96] : memref<1x4x1024xf32, #tpu.memory_space<vmem>>, vector<1x4x32xf32>
    %55 = vector.shape_cast %54 : vector<1x4x32xf32> to vector<4x32xf32>
    %56 = vector.shape_cast %53 : vector<4x32xf32> to vector<1x4x32xf32>
    tpu.vector_store %arg5[%c0_44, %c0_45, %c96], %56 {strides = array<i32>} : memref<1x4x1024xf32, #tpu.memory_space<vmem>>, vector<1x4x32xf32>,
    %57 = vector.extract_strided_slice %6 {offsets = [0, 32], sizes = [16, 16], strides = [1, 1]} : vector<16x256xf32> to vector<16x16xf32>
    %58 = vector.extract_strided_slice %57 {offsets = [0, 0], sizes = [4, 16], strides = [1, 1]} : vector<16x16xf32> to vector<4x16xf32>
    %c0_46 = arith.constant 0 : index
    %c0_47 = arith.constant 0 : index
    %c0_48 = arith.constant 0 : index
    %59 = vector.load %arg4[%c0_46, %c0_47, %c0_48] : memref<2x16x32xf32, #tpu.memory_space<vmem>>, vector<1x16x32xf32>
    %60 = vector.shape_cast %59 : vector<1x16x32xf32> to vector<16x32xf32>
    %cst_49 = arith.constant dense<0.000000e+00> : vector<4x32xf32>
    %61 = tpu.matmul %58, %60, %cst_49 {dimension_numbers = #tpu.dot_dimension_numbers<[1], [0], [0], [1], [0, 0, 1, 1], [], []>} : vector<4x16xf32>, vector<16x32xf32>, vector<4x32xf32> -> vector<4x32xf32>
    %62 = vector.extract_strided_slice %57 {offsets = [4, 0], sizes = [4, 16], strides = [1, 1]} : vector<16x16xf32> to vector<4x16xf32>
    %c1_50 = arith.constant 1 : index
    %c0_51 = arith.constant 0 : index
    %c0_52 = arith.constant 0 : index
    %63 = vector.load %arg4[%c1_50, %c0_51, %c0_52] : memref<2x16x32xf32, #tpu.memory_space<vmem>>, vector<1x16x32xf32>
    %64 = vector.shape_cast %63 : vector<1x16x32xf32> to vector<16x32xf32>
    %cst_53 = arith.constant dense<0.000000e+00> : vector<4x32xf32>
    %65 = tpu.matmul %62, %64, %cst_53 {dimension_numbers = #tpu.dot_dimension_numbers<[1], [0], [0], [1], [0, 0, 1, 1], [], []>} : vector<4x16xf32>, vector<16x32xf32>, vector<4x32xf32> -> vector<4x32xf32>
    %66 = arith.addf %61, %65 : vector<4x32xf32>
    %c0_54 = arith.constant 0 : index
    %c0_55 = arith.constant 0 : index
    %c128 = arith.constant 128 : index
    %67 = vector.load %arg5[%c0_54, %c0_55, %c128] : memref<1x4x1024xf32, #tpu.memory_space<vmem>>, vector<1x4x32xf32>
    %68 = vector.shape_cast %67 : vector<1x4x32xf32> to vector<4x32xf32>
    %69 = vector.shape_cast %66 : vector<4x32xf32> to vector<1x4x32xf32>
    tpu.vector_store %arg5[%c0_54, %c0_55, %c128], %69 {strides = array<i32>} : memref<1x4x1024xf32, #tpu.memory_space<vmem>>, vector<1x4x32xf32>,
    %70 = vector.extract_strided_slice %57 {offsets = [8, 0], sizes = [4, 16], strides = [1, 1]} : vector<16x16xf32> to vector<4x16xf32>
    %c0_56 = arith.constant 0 : index
    %c0_57 = arith.constant 0 : index
    %c0_58 = arith.constant 0 : index
    %71 = vector.load %arg4[%c0_56, %c0_57, %c0_58] : memref<2x16x32xf32, #tpu.memory_space<vmem>>, vector<1x16x32xf32>
    %72 = vector.shape_cast %71 : vector<1x16x32xf32> to vector<16x32xf32>
    %cst_59 = arith.constant dense<0.000000e+00> : vector<4x32xf32>
    %73 = tpu.matmul %70, %72, %cst_59 {dimension_numbers = #tpu.dot_dimension_numbers<[1], [0], [0], [1], [0, 0, 1, 1], [], []>} : vector<4x16xf32>, vector<16x32xf32>, vector<4x32xf32> -> vector<4x32xf32>
    %74 = vector.extract_strided_slice %57 {offsets = [12, 0], sizes = [4, 16], strides = [1, 1]} : vector<16x16xf32> to vector<4x16xf32>
    %c1_60 = arith.constant 1 : index
    %c0_61 = arith.constant 0 : index
    %c0_62 = arith.constant 0 : index
    %75 = vector.load %arg4[%c1_60, %c0_61, %c0_62] : memref<2x16x32xf32, #tpu.memory_space<vmem>>, vector<1x16x32xf32>
    %76 = vector.shape_cast %75 : vector<1x16x32xf32> to vector<16x32xf32>
    %cst_63 = arith.constant dense<0.000000e+00> : vector<4x32xf32>
    %77 = tpu.matmul %74, %76, %cst_63 {dimension_numbers = #tpu.dot_dimension_numbers<[1], [0], [0], [1], [0, 0, 1, 1], [], []>} : vector<4x16xf32>, vector<16x32xf32>, vector<4x32xf32> -> vector<4x32xf32>
    %78 = arith.addf %73, %77 : vector<4x32xf32>
    %c0_64 = arith.constant 0 : index
    %c0_65 = arith.constant 0 : index
    %c160 = arith.constant 160 : index
    %79 = vector.load %arg5[%c0_64, %c0_65, %c160] : memref<1x4x1024xf32, #tpu.memory_space<vmem>>, vector<1x4x32xf32>
    %80 = vector.shape_cast %79 : vector<1x4x32xf32> to vector<4x32xf32>
    %81 = vector.shape_cast %78 : vector<4x32xf32> to vector<1x4x32xf32>
    tpu.vector_store %arg5[%c0_64, %c0_65, %c160], %81 {strides = array<i32>} : memref<1x4x1024xf32, #tpu.memory_space<vmem>>, vector<1x4x32xf32>,
    %82 = vector.extract_strided_slice %6 {offsets = [0, 48], sizes = [16, 16], strides = [1, 1]} : vector<16x256xf32> to vector<16x16xf32>
    %83 = vector.extract_strided_slice %82 {offsets = [0, 0], sizes = [4, 16], strides = [1, 1]} : vector<16x16xf32> to vector<4x16xf32>
    %c0_66 = arith.constant 0 : index
    %c0_67 = arith.constant 0 : index
    %c0_68 = arith.constant 0 : index
    %84 = vector.load %arg4[%c0_66, %c0_67, %c0_68] : memref<2x16x32xf32, #tpu.memory_space<vmem>>, vector<1x16x32xf32>
    %85 = vector.shape_cast %84 : vector<1x16x32xf32> to vector<16x32xf32>
    %cst_69 = arith.constant dense<0.000000e+00> : vector<4x32xf32>
    %86 = tpu.matmul %83, %85, %cst_69 {dimension_numbers = #tpu.dot_dimension_numbers<[1], [0], [0], [1], [0, 0, 1, 1], [], []>} : vector<4x16xf32>, vector<16x32xf32>, vector<4x32xf32> -> vector<4x32xf32>
    %87 = vector.extract_strided_slice %82 {offsets = [4, 0], sizes = [4, 16], strides = [1, 1]} : vector<16x16xf32> to vector<4x16xf32>
    %c1_70 = arith.constant 1 : index
    %c0_71 = arith.constant 0 : index
    %c0_72 = arith.constant 0 : index
    %88 = vector.load %arg4[%c1_70, %c0_71, %c0_72] : memref<2x16x32xf32, #tpu.memory_space<vmem>>, vector<1x16x32xf32>
    %89 = vector.shape_cast %88 : vector<1x16x32xf32> to vector<16x32xf32>
    %cst_73 = arith.constant dense<0.000000e+00> : vector<4x32xf32>
    %90 = tpu.matmul %87, %89, %cst_73 {dimension_numbers = #tpu.dot_dimension_numbers<[1], [0], [0], [1], [0, 0, 1, 1], [], []>} : vector<4x16xf32>, vector<16x32xf32>, vector<4x32xf32> -> vector<4x32xf32>
    %91 = arith.addf %86, %90 : vector<4x32xf32>
    %c0_74 = arith.constant 0 : index
    %c0_75 = arith.constant 0 : index
    %c192 = arith.constant 192 : index
    %92 = vector.load %arg5[%c0_74, %c0_75, %c192] : memref<1x4x1024xf32, #tpu.memory_space<vmem>>, vector<1x4x32xf32>
    %93 = vector.shape_cast %92 : vector<1x4x32xf32> to vector<4x32xf32>
    %94 = vector.shape_cast %91 : vector<4x32xf32> to vector<1x4x32xf32>
    tpu.vector_store %arg5[%c0_74, %c0_75, %c192], %94 {strides = array<i32>} : memref<1x4x1024xf32, #tpu.memory_space<vmem>>, vector<1x4x32xf32>,
    %95 = vector.extract_strided_slice %82 {offsets = [8, 0], sizes = [4, 16], strides = [1, 1]} : vector<16x16xf32> to vector<4x16xf32>
    %c0_76 = arith.constant 0 : index
    %c0_77 = arith.constant 0 : index
    %c0_78 = arith.constant 0 : index
    %96 = vector.load %arg4[%c0_76, %c0_77, %c0_78] : memref<2x16x32xf32, #tpu.memory_space<vmem>>, vector<1x16x32xf32>
    %97 = vector.shape_cast %96 : vector<1x16x32xf32> to vector<16x32xf32>
    %cst_79 = arith.constant dense<0.000000e+00> : vector<4x32xf32>
    %98 = tpu.matmul %95, %97, %cst_79 {dimension_numbers = #tpu.dot_dimension_numbers<[1], [0], [0], [1], [0, 0, 1, 1], [], []>} : vector<4x16xf32>, vector<16x32xf32>, vector<4x32xf32> -> vector<4x32xf32>
    %99 = vector.extract_strided_slice %82 {offsets = [12, 0], sizes = [4, 16], strides = [1, 1]} : vector<16x16xf32> to vector<4x16xf32>
    %c1_80 = arith.constant 1 : index
    %c0_81 = arith.constant 0 : index
    %c0_82 = arith.constant 0 : index
    %100 = vector.load %arg4[%c1_80, %c0_81, %c0_82] : memref<2x16x32xf32, #tpu.memory_space<vmem>>, vector<1x16x32xf32>
    %101 = vector.shape_cast %100 : vector<1x16x32xf32> to vector<16x32xf32>
    %cst_83 = arith.constant dense<0.000000e+00> : vector<4x32xf32>
    %102 = tpu.matmul %99, %101, %cst_83 {dimension_numbers = #tpu.dot_dimension_numbers<[1], [0], [0], [1], [0, 0, 1, 1], [], []>} : vector<4x16xf32>, vector<16x32xf32>, vector<4x32xf32> -> vector<4x32xf32>
    %103 = arith.addf %98, %102 : vector<4x32xf32>
    %c0_84 = arith.constant 0 : index
    %c0_85 = arith.constant 0 : index
    %c224 = arith.constant 224 : index
    %104 = vector.load %arg5[%c0_84, %c0_85, %c224] : memref<1x4x1024xf32, #tpu.memory_space<vmem>>, vector<1x4x32xf32>
    %105 = vector.shape_cast %104 : vector<1x4x32xf32> to vector<4x32xf32>
    %106 = vector.shape_cast %103 : vector<4x32xf32> to vector<1x4x32xf32>
    tpu.vector_store %arg5[%c0_84, %c0_85, %c224], %106 {strides = array<i32>} : memref<1x4x1024xf32, #tpu.memory_space<vmem>>, vector<1x4x32xf32>,
    %107 = vector.extract_strided_slice %6 {offsets = [0, 64], sizes = [16, 16], strides = [1, 1]} : vector<16x256xf32> to vector<16x16xf32>
    %108 = vector.extract_strided_slice %107 {offsets = [0, 0], sizes = [4, 16], strides = [1, 1]} : vector<16x16xf32> to vector<4x16xf32>
    %c0_86 = arith.constant 0 : index
    %c0_87 = arith.constant 0 : index
    %c0_88 = arith.constant 0 : index
    %109 = vector.load %arg4[%c0_86, %c0_87, %c0_88] : memref<2x16x32xf32, #tpu.memory_space<vmem>>, vector<1x16x32xf32>
    %110 = vector.shape_cast %109 : vector<1x16x32xf32> to vector<16x32xf32>
    %cst_89 = arith.constant dense<0.000000e+00> : vector<4x32xf32>
    %111 = tpu.matmul %108, %110, %cst_89 {dimension_numbers = #tpu.dot_dimension_numbers<[1], [0], [0], [1], [0, 0, 1, 1], [], []>} : vector<4x16xf32>, vector<16x32xf32>, vector<4x32xf32> -> vector<4x32xf32>
    %112 = vector.extract_strided_slice %107 {offsets = [4, 0], sizes = [4, 16], strides = [1, 1]} : vector<16x16xf32> to vector<4x16xf32>
    %c1_90 = arith.constant 1 : index
    %c0_91 = arith.constant 0 : index
    %c0_92 = arith.constant 0 : index
    %113 = vector.load %arg4[%c1_90, %c0_91, %c0_92] : memref<2x16x32xf32, #tpu.memory_space<vmem>>, vector<1x16x32xf32>
    %114 = vector.shape_cast %113 : vector<1x16x32xf32> to vector<16x32xf32>
    %cst_93 = arith.constant dense<0.000000e+00> : vector<4x32xf32>
    %115 = tpu.matmul %112, %114, %cst_93 {dimension_numbers = #tpu.dot_dimension_numbers<[1], [0], [0], [1], [0, 0, 1, 1], [], []>} : vector<4x16xf32>, vector<16x32xf32>, vector<4x32xf32> -> vector<4x32xf32>
    %116 = arith.addf %111, %115 : vector<4x32xf32>
    %c0_94 = arith.constant 0 : index
    %c0_95 = arith.constant 0 : index
    %c256 = arith.constant 256 : index
    %117 = vector.load %arg5[%c0_94, %c0_95, %c256] : memref<1x4x1024xf32, #tpu.memory_space<vmem>>, vector<1x4x32xf32>
    %118 = vector.shape_cast %117 : vector<1x4x32xf32> to vector<4x32xf32>
    %119 = vector.shape_cast %116 : vector<4x32xf32> to vector<1x4x32xf32>
    tpu.vector_store %arg5[%c0_94, %c0_95, %c256], %119 {strides = array<i32>} : memref<1x4x1024xf32, #tpu.memory_space<vmem>>, vector<1x4x32xf32>,
    %120 = vector.extract_strided_slice %107 {offsets = [8, 0], sizes = [4, 16], strides = [1, 1]} : vector<16x16xf32> to vector<4x16xf32>
    %c0_96 = arith.constant 0 : index
    %c0_97 = arith.constant 0 : index
    %c0_98 = arith.constant 0 : index
    %121 = vector.load %arg4[%c0_96, %c0_97, %c0_98] : memref<2x16x32xf32, #tpu.memory_space<vmem>>, vector<1x16x32xf32>
    %122 = vector.shape_cast %121 : vector<1x16x32xf32> to vector<16x32xf32>
    %cst_99 = arith.constant dense<0.000000e+00> : vector<4x32xf32>
    %123 = tpu.matmul %120, %122, %cst_99 {dimension_numbers = #tpu.dot_dimension_numbers<[1], [0], [0], [1], [0, 0, 1, 1], [], []>} : vector<4x16xf32>, vector<16x32xf32>, vector<4x32xf32> -> vector<4x32xf32>
    %124 = vector.extract_strided_slice %107 {offsets = [12, 0], sizes = [4, 16], strides = [1, 1]} : vector<16x16xf32> to vector<4x16xf32>
    %c1_100 = arith.constant 1 : index
    %c0_101 = arith.constant 0 : index
    %c0_102 = arith.constant 0 : index
    %125 = vector.load %arg4[%c1_100, %c0_101, %c0_102] : memref<2x16x32xf32, #tpu.memory_space<vmem>>, vector<1x16x32xf32>
    %126 = vector.shape_cast %125 : vector<1x16x32xf32> to vector<16x32xf32>
    %cst_103 = arith.constant dense<0.000000e+00> : vector<4x32xf32>
    %127 = tpu.matmul %124, %126, %cst_103 {dimension_numbers = #tpu.dot_dimension_numbers<[1], [0], [0], [1], [0, 0, 1, 1], [], []>} : vector<4x16xf32>, vector<16x32xf32>, vector<4x32xf32> -> vector<4x32xf32>
    %128 = arith.addf %123, %127 : vector<4x32xf32>
    %c0_104 = arith.constant 0 : index
    %c0_105 = arith.constant 0 : index
    %c288 = arith.constant 288 : index
    %129 = vector.load %arg5[%c0_104, %c0_105, %c288] : memref<1x4x1024xf32, #tpu.memory_space<vmem>>, vector<1x4x32xf32>
    %130 = vector.shape_cast %129 : vector<1x4x32xf32> to vector<4x32xf32>
    %131 = vector.shape_cast %128 : vector<4x32xf32> to vector<1x4x32xf32>
    tpu.vector_store %arg5[%c0_104, %c0_105, %c288], %131 {strides = array<i32>} : memref<1x4x1024xf32, #tpu.memory_space<vmem>>, vector<1x4x32xf32>,
    %132 = vector.extract_strided_slice %6 {offsets = [0, 80], sizes = [16, 16], strides = [1, 1]} : vector<16x256xf32> to vector<16x16xf32>
    %133 = vector.extract_strided_slice %132 {offsets = [0, 0], sizes = [4, 16], strides = [1, 1]} : vector<16x16xf32> to vector<4x16xf32>
    %c0_106 = arith.constant 0 : index
    %c0_107 = arith.constant 0 : index
    %c0_108 = arith.constant 0 : index
    %134 = vector.load %arg4[%c0_106, %c0_107, %c0_108] : memref<2x16x32xf32, #tpu.memory_space<vmem>>, vector<1x16x32xf32>
    %135 = vector.shape_cast %134 : vector<1x16x32xf32> to vector<16x32xf32>
    %cst_109 = arith.constant dense<0.000000e+00> : vector<4x32xf32>
    %136 = tpu.matmul %133, %135, %cst_109 {dimension_numbers = #tpu.dot_dimension_numbers<[1], [0], [0], [1], [0, 0, 1, 1], [], []>} : vector<4x16xf32>, vector<16x32xf32>, vector<4x32xf32> -> vector<4x32xf32>
    %137 = vector.extract_strided_slice %132 {offsets = [4, 0], sizes = [4, 16], strides = [1, 1]} : vector<16x16xf32> to vector<4x16xf32>
    %c1_110 = arith.constant 1 : index
    %c0_111 = arith.constant 0 : index
    %c0_112 = arith.constant 0 : index
    %138 = vector.load %arg4[%c1_110, %c0_111, %c0_112] : memref<2x16x32xf32, #tpu.memory_space<vmem>>, vector<1x16x32xf32>
    %139 = vector.shape_cast %138 : vector<1x16x32xf32> to vector<16x32xf32>
    %cst_113 = arith.constant dense<0.000000e+00> : vector<4x32xf32>
    %140 = tpu.matmul %137, %139, %cst_113 {dimension_numbers = #tpu.dot_dimension_numbers<[1], [0], [0], [1], [0, 0, 1, 1], [], []>} : vector<4x16xf32>, vector<16x32xf32>, vector<4x32xf32> -> vector<4x32xf32>
    %141 = arith.addf %136, %140 : vector<4x32xf32>
    %c0_114 = arith.constant 0 : index
    %c0_115 = arith.constant 0 : index
    %c320 = arith.constant 320 : index
    %142 = vector.load %arg5[%c0_114, %c0_115, %c320] : memref<1x4x1024xf32, #tpu.memory_space<vmem>>, vector<1x4x32xf32>
    %143 = vector.shape_cast %142 : vector<1x4x32xf32> to vector<4x32xf32>
    %144 = vector.shape_cast %141 : vector<4x32xf32> to vector<1x4x32xf32>
    tpu.vector_store %arg5[%c0_114, %c0_115, %c320], %144 {strides = array<i32>} : memref<1x4x1024xf32, #tpu.memory_space<vmem>>, vector<1x4x32xf32>,
    %145 = vector.extract_strided_slice %132 {offsets = [8, 0], sizes = [4, 16], strides = [1, 1]} : vector<16x16xf32> to vector<4x16xf32>
    %c0_116 = arith.constant 0 : index
    %c0_117 = arith.constant 0 : index
    %c0_118 = arith.constant 0 : index
    %146 = vector.load %arg4[%c0_116, %c0_117, %c0_118] : memref<2x16x32xf32, #tpu.memory_space<vmem>>, vector<1x16x32xf32>
    %147 = vector.shape_cast %146 : vector<1x16x32xf32> to vector<16x32xf32>
    %cst_119 = arith.constant dense<0.000000e+00> : vector<4x32xf32>
    %148 = tpu.matmul %145, %147, %cst_119 {dimension_numbers = #tpu.dot_dimension_numbers<[1], [0], [0], [1], [0, 0, 1, 1], [], []>} : vector<4x16xf32>, vector<16x32xf32>, vector<4x32xf32> -> vector<4x32xf32>
    %149 = vector.extract_strided_slice %132 {offsets = [12, 0], sizes = [4, 16], strides = [1, 1]} : vector<16x16xf32> to vector<4x16xf32>
    %c1_120 = arith.constant 1 : index
    %c0_121 = arith.constant 0 : index
    %c0_122 = arith.constant 0 : index
    %150 = vector.load %arg4[%c1_120, %c0_121, %c0_122] : memref<2x16x32xf32, #tpu.memory_space<vmem>>, vector<1x16x32xf32>
    %151 = vector.shape_cast %150 : vector<1x16x32xf32> to vector<16x32xf32>
    %cst_123 = arith.constant dense<0.000000e+00> : vector<4x32xf32>
    %152 = tpu.matmul %149, %151, %cst_123 {dimension_numbers = #tpu.dot_dimension_numbers<[1], [0], [0], [1], [0, 0, 1, 1], [], []>} : vector<4x16xf32>, vector<16x32xf32>, vector<4x32xf32> -> vector<4x32xf32>
    %153 = arith.addf %148, %152 : vector<4x32xf32>
    %c0_124 = arith.constant 0 : index
    %c0_125 = arith.constant 0 : index
    %c352 = arith.constant 352 : index
    %154 = vector.load %arg5[%c0_124, %c0_125, %c352] : memref<1x4x1024xf32, #tpu.memory_space<vmem>>, vector<1x4x32xf32>
    %155 = vector.shape_cast %154 : vector<1x4x32xf32> to vector<4x32xf32>
    %156 = vector.shape_cast %153 : vector<4x32xf32> to vector<1x4x32xf32>
    tpu.vector_store %arg5[%c0_124, %c0_125, %c352], %156 {strides = array<i32>} : memref<1x4x1024xf32, #tpu.memory_space<vmem>>, vector<1x4x32xf32>,
    %157 = vector.extract_strided_slice %6 {offsets = [0, 96], sizes = [16, 16], strides = [1, 1]} : vector<16x256xf32> to vector<16x16xf32>
    %158 = vector.extract_strided_slice %157 {offsets = [0, 0], sizes = [4, 16], strides = [1, 1]} : vector<16x16xf32> to vector<4x16xf32>
    %c0_126 = arith.constant 0 : index
    %c0_127 = arith.constant 0 : index
    %c0_128 = arith.constant 0 : index
    %159 = vector.load %arg4[%c0_126, %c0_127, %c0_128] : memref<2x16x32xf32, #tpu.memory_space<vmem>>, vector<1x16x32xf32>
    %160 = vector.shape_cast %159 : vector<1x16x32xf32> to vector<16x32xf32>
    %cst_129 = arith.constant dense<0.000000e+00> : vector<4x32xf32>
    %161 = tpu.matmul %158, %160, %cst_129 {dimension_numbers = #tpu.dot_dimension_numbers<[1], [0], [0], [1], [0, 0, 1, 1], [], []>} : vector<4x16xf32>, vector<16x32xf32>, vector<4x32xf32> -> vector<4x32xf32>
    %162 = vector.extract_strided_slice %157 {offsets = [4, 0], sizes = [4, 16], strides = [1, 1]} : vector<16x16xf32> to vector<4x16xf32>
    %c1_130 = arith.constant 1 : index
    %c0_131 = arith.constant 0 : index
    %c0_132 = arith.constant 0 : index
    %163 = vector.load %arg4[%c1_130, %c0_131, %c0_132] : memref<2x16x32xf32, #tpu.memory_space<vmem>>, vector<1x16x32xf32>
    %164 = vector.shape_cast %163 : vector<1x16x32xf32> to vector<16x32xf32>
    %cst_133 = arith.constant dense<0.000000e+00> : vector<4x32xf32>
    %165 = tpu.matmul %162, %164, %cst_133 {dimension_numbers = #tpu.dot_dimension_numbers<[1], [0], [0], [1], [0, 0, 1, 1], [], []>} : vector<4x16xf32>, vector<16x32xf32>, vector<4x32xf32> -> vector<4x32xf32>
    %166 = arith.addf %161, %165 : vector<4x32xf32>
    %c0_134 = arith.constant 0 : index
    %c0_135 = arith.constant 0 : index
    %c384 = arith.constant 384 : index
    %167 = vector.load %arg5[%c0_134, %c0_135, %c384] : memref<1x4x1024xf32, #tpu.memory_space<vmem>>, vector<1x4x32xf32>
    %168 = vector.shape_cast %167 : vector<1x4x32xf32> to vector<4x32xf32>
    %169 = vector.shape_cast %166 : vector<4x32xf32> to vector<1x4x32xf32>
    tpu.vector_store %arg5[%c0_134, %c0_135, %c384], %169 {strides = array<i32>} : memref<1x4x1024xf32, #tpu.memory_space<vmem>>, vector<1x4x32xf32>,
    %170 = vector.extract_strided_slice %157 {offsets = [8, 0], sizes = [4, 16], strides = [1, 1]} : vector<16x16xf32> to vector<4x16xf32>
    %c0_136 = arith.constant 0 : index
    %c0_137 = arith.constant 0 : index
    %c0_138 = arith.constant 0 : index
    %171 = vector.load %arg4[%c0_136, %c0_137, %c0_138] : memref<2x16x32xf32, #tpu.memory_space<vmem>>, vector<1x16x32xf32>
    %172 = vector.shape_cast %171 : vector<1x16x32xf32> to vector<16x32xf32>
    %cst_139 = arith.constant dense<0.000000e+00> : vector<4x32xf32>
    %173 = tpu.matmul %170, %172, %cst_139 {dimension_numbers = #tpu.dot_dimension_numbers<[1], [0], [0], [1], [0, 0, 1, 1], [], []>} : vector<4x16xf32>, vector<16x32xf32>, vector<4x32xf32> -> vector<4x32xf32>
    %174 = vector.extract_strided_slice %157 {offsets = [12, 0], sizes = [4, 16], strides = [1, 1]} : vector<16x16xf32> to vector<4x16xf32>
    %c1_140 = arith.constant 1 : index
    %c0_141 = arith.constant 0 : index
    %c0_142 = arith.constant 0 : index
    %175 = vector.load %arg4[%c1_140, %c0_141, %c0_142] : memref<2x16x32xf32, #tpu.memory_space<vmem>>, vector<1x16x32xf32>
    %176 = vector.shape_cast %175 : vector<1x16x32xf32> to vector<16x32xf32>
    %cst_143 = arith.constant dense<0.000000e+00> : vector<4x32xf32>
    %177 = tpu.matmul %174, %176, %cst_143 {dimension_numbers = #tpu.dot_dimension_numbers<[1], [0], [0], [1], [0, 0, 1, 1], [], []>} : vector<4x16xf32>, vector<16x32xf32>, vector<4x32xf32> -> vector<4x32xf32>
    %178 = arith.addf %173, %177 : vector<4x32xf32>
    %c0_144 = arith.constant 0 : index
    %c0_145 = arith.constant 0 : index
    %c416 = arith.constant 416 : index
    %179 = vector.load %arg5[%c0_144, %c0_145, %c416] : memref<1x4x1024xf32, #tpu.memory_space<vmem>>, vector<1x4x32xf32>
    %180 = vector.shape_cast %179 : vector<1x4x32xf32> to vector<4x32xf32>
    %181 = vector.shape_cast %178 : vector<4x32xf32> to vector<1x4x32xf32>
    tpu.vector_store %arg5[%c0_144, %c0_145, %c416], %181 {strides = array<i32>} : memref<1x4x1024xf32, #tpu.memory_space<vmem>>, vector<1x4x32xf32>,
    %182 = vector.extract_strided_slice %6 {offsets = [0, 112], sizes = [16, 16], strides = [1, 1]} : vector<16x256xf32> to vector<16x16xf32>
    %183 = vector.extract_strided_slice %182 {offsets = [0, 0], sizes = [4, 16], strides = [1, 1]} : vector<16x16xf32> to vector<4x16xf32>
    %c0_146 = arith.constant 0 : index
    %c0_147 = arith.constant 0 : index
    %c0_148 = arith.constant 0 : index
    %184 = vector.load %arg4[%c0_146, %c0_147, %c0_148] : memref<2x16x32xf32, #tpu.memory_space<vmem>>, vector<1x16x32xf32>
    %185 = vector.shape_cast %184 : vector<1x16x32xf32> to vector<16x32xf32>
    %cst_149 = arith.constant dense<0.000000e+00> : vector<4x32xf32>
    %186 = tpu.matmul %183, %185, %cst_149 {dimension_numbers = #tpu.dot_dimension_numbers<[1], [0], [0], [1], [0, 0, 1, 1], [], []>} : vector<4x16xf32>, vector<16x32xf32>, vector<4x32xf32> -> vector<4x32xf32>
    %187 = vector.extract_strided_slice %182 {offsets = [4, 0], sizes = [4, 16], strides = [1, 1]} : vector<16x16xf32> to vector<4x16xf32>
    %c1_150 = arith.constant 1 : index
    %c0_151 = arith.constant 0 : index
    %c0_152 = arith.constant 0 : index
    %188 = vector.load %arg4[%c1_150, %c0_151, %c0_152] : memref<2x16x32xf32, #tpu.memory_space<vmem>>, vector<1x16x32xf32>
    %189 = vector.shape_cast %188 : vector<1x16x32xf32> to vector<16x32xf32>
    %cst_153 = arith.constant dense<0.000000e+00> : vector<4x32xf32>
    %190 = tpu.matmul %187, %189, %cst_153 {dimension_numbers = #tpu.dot_dimension_numbers<[1], [0], [0], [1], [0, 0, 1, 1], [], []>} : vector<4x16xf32>, vector<16x32xf32>, vector<4x32xf32> -> vector<4x32xf32>
    %191 = arith.addf %186, %190 : vector<4x32xf32>
    %c0_154 = arith.constant 0 : index
    %c0_155 = arith.constant 0 : index
    %c448 = arith.constant 448 : index
    %192 = vector.load %arg5[%c0_154, %c0_155, %c448] : memref<1x4x1024xf32, #tpu.memory_space<vmem>>, vector<1x4x32xf32>
    %193 = vector.shape_cast %192 : vector<1x4x32xf32> to vector<4x32xf32>
    %194 = vector.shape_cast %191 : vector<4x32xf32> to vector<1x4x32xf32>
    tpu.vector_store %arg5[%c0_154, %c0_155, %c448], %194 {strides = array<i32>} : memref<1x4x1024xf32, #tpu.memory_space<vmem>>, vector<1x4x32xf32>,
    %195 = vector.extract_strided_slice %182 {offsets = [8, 0], sizes = [4, 16], strides = [1, 1]} : vector<16x16xf32> to vector<4x16xf32>
    %c0_156 = arith.constant 0 : index
    %c0_157 = arith.constant 0 : index
    %c0_158 = arith.constant 0 : index
    %196 = vector.load %arg4[%c0_156, %c0_157, %c0_158] : memref<2x16x32xf32, #tpu.memory_space<vmem>>, vector<1x16x32xf32>
    %197 = vector.shape_cast %196 : vector<1x16x32xf32> to vector<16x32xf32>
    %cst_159 = arith.constant dense<0.000000e+00> : vector<4x32xf32>
    %198 = tpu.matmul %195, %197, %cst_159 {dimension_numbers = #tpu.dot_dimension_numbers<[1], [0], [0], [1], [0, 0, 1, 1], [], []>} : vector<4x16xf32>, vector<16x32xf32>, vector<4x32xf32> -> vector<4x32xf32>
    %199 = vector.extract_strided_slice %182 {offsets = [12, 0], sizes = [4, 16], strides = [1, 1]} : vector<16x16xf32> to vector<4x16xf32>
    %c1_160 = arith.constant 1 : index
    %c0_161 = arith.constant 0 : index
    %c0_162 = arith.constant 0 : index
    %200 = vector.load %arg4[%c1_160, %c0_161, %c0_162] : memref<2x16x32xf32, #tpu.memory_space<vmem>>, vector<1x16x32xf32>
    %201 = vector.shape_cast %200 : vector<1x16x32xf32> to vector<16x32xf32>
    %cst_163 = arith.constant dense<0.000000e+00> : vector<4x32xf32>
    %202 = tpu.matmul %199, %201, %cst_163 {dimension_numbers = #tpu.dot_dimension_numbers<[1], [0], [0], [1], [0, 0, 1, 1], [], []>} : vector<4x16xf32>, vector<16x32xf32>, vector<4x32xf32> -> vector<4x32xf32>
    %203 = arith.addf %198, %202 : vector<4x32xf32>
    %c0_164 = arith.constant 0 : index
    %c0_165 = arith.constant 0 : index
    %c480 = arith.constant 480 : index
    %204 = vector.load %arg5[%c0_164, %c0_165, %c480] : memref<1x4x1024xf32, #tpu.memory_space<vmem>>, vector<1x4x32xf32>
    %205 = vector.shape_cast %204 : vector<1x4x32xf32> to vector<4x32xf32>
    %206 = vector.shape_cast %203 : vector<4x32xf32> to vector<1x4x32xf32>
    tpu.vector_store %arg5[%c0_164, %c0_165, %c480], %206 {strides = array<i32>} : memref<1x4x1024xf32, #tpu.memory_space<vmem>>, vector<1x4x32xf32>,
    %207 = vector.extract_strided_slice %6 {offsets = [0, 128], sizes = [16, 16], strides = [1, 1]} : vector<16x256xf32> to vector<16x16xf32>
    %208 = vector.extract_strided_slice %207 {offsets = [0, 0], sizes = [4, 16], strides = [1, 1]} : vector<16x16xf32> to vector<4x16xf32>
    %c0_166 = arith.constant 0 : index
    %c0_167 = arith.constant 0 : index
    %c0_168 = arith.constant 0 : index
    %209 = vector.load %arg4[%c0_166, %c0_167, %c0_168] : memref<2x16x32xf32, #tpu.memory_space<vmem>>, vector<1x16x32xf32>
    %210 = vector.shape_cast %209 : vector<1x16x32xf32> to vector<16x32xf32>
    %cst_169 = arith.constant dense<0.000000e+00> : vector<4x32xf32>
    %211 = tpu.matmul %208, %210, %cst_169 {dimension_numbers = #tpu.dot_dimension_numbers<[1], [0], [0], [1], [0, 0, 1, 1], [], []>} : vector<4x16xf32>, vector<16x32xf32>, vector<4x32xf32> -> vector<4x32xf32>
    %212 = vector.extract_strided_slice %207 {offsets = [4, 0], sizes = [4, 16], strides = [1, 1]} : vector<16x16xf32> to vector<4x16xf32>
    %c1_170 = arith.constant 1 : index
    %c0_171 = arith.constant 0 : index
    %c0_172 = arith.constant 0 : index
    %213 = vector.load %arg4[%c1_170, %c0_171, %c0_172] : memref<2x16x32xf32, #tpu.memory_space<vmem>>, vector<1x16x32xf32>
    %214 = vector.shape_cast %213 : vector<1x16x32xf32> to vector<16x32xf32>
    %cst_173 = arith.constant dense<0.000000e+00> : vector<4x32xf32>
    %215 = tpu.matmul %212, %214, %cst_173 {dimension_numbers = #tpu.dot_dimension_numbers<[1], [0], [0], [1], [0, 0, 1, 1], [], []>} : vector<4x16xf32>, vector<16x32xf32>, vector<4x32xf32> -> vector<4x32xf32>
    %216 = arith.addf %211, %215 : vector<4x32xf32>
    %c0_174 = arith.constant 0 : index
    %c0_175 = arith.constant 0 : index
    %c512 = arith.constant 512 : index
    %217 = vector.load %arg5[%c0_174, %c0_175, %c512] : memref<1x4x1024xf32, #tpu.memory_space<vmem>>, vector<1x4x32xf32>
    %218 = vector.shape_cast %217 : vector<1x4x32xf32> to vector<4x32xf32>
    %219 = vector.shape_cast %216 : vector<4x32xf32> to vector<1x4x32xf32>
    tpu.vector_store %arg5[%c0_174, %c0_175, %c512], %219 {strides = array<i32>} : memref<1x4x1024xf32, #tpu.memory_space<vmem>>, vector<1x4x32xf32>,
    %220 = vector.extract_strided_slice %207 {offsets = [8, 0], sizes = [4, 16], strides = [1, 1]} : vector<16x16xf32> to vector<4x16xf32>
    %c0_176 = arith.constant 0 : index
    %c0_177 = arith.constant 0 : index
    %c0_178 = arith.constant 0 : index
    %221 = vector.load %arg4[%c0_176, %c0_177, %c0_178] : memref<2x16x32xf32, #tpu.memory_space<vmem>>, vector<1x16x32xf32>
    %222 = vector.shape_cast %221 : vector<1x16x32xf32> to vector<16x32xf32>
    %cst_179 = arith.constant dense<0.000000e+00> : vector<4x32xf32>
    %223 = tpu.matmul %220, %222, %cst_179 {dimension_numbers = #tpu.dot_dimension_numbers<[1], [0], [0], [1], [0, 0, 1, 1], [], []>} : vector<4x16xf32>, vector<16x32xf32>, vector<4x32xf32> -> vector<4x32xf32>
    %224 = vector.extract_strided_slice %207 {offsets = [12, 0], sizes = [4, 16], strides = [1, 1]} : vector<16x16xf32> to vector<4x16xf32>
    %c1_180 = arith.constant 1 : index
    %c0_181 = arith.constant 0 : index
    %c0_182 = arith.constant 0 : index
    %225 = vector.load %arg4[%c1_180, %c0_181, %c0_182] : memref<2x16x32xf32, #tpu.memory_space<vmem>>, vector<1x16x32xf32>
    %226 = vector.shape_cast %225 : vector<1x16x32xf32> to vector<16x32xf32>
    %cst_183 = arith.constant dense<0.000000e+00> : vector<4x32xf32>
    %227 = tpu.matmul %224, %226, %cst_183 {dimension_numbers = #tpu.dot_dimension_numbers<[1], [0], [0], [1], [0, 0, 1, 1], [], []>} : vector<4x16xf32>, vector<16x32xf32>, vector<4x32xf32> -> vector<4x32xf32>
    %228 = arith.addf %223, %227 : vector<4x32xf32>
    %c0_184 = arith.constant 0 : index
    %c0_185 = arith.constant 0 : index
    %c544 = arith.constant 544 : index
    %229 = vector.load %arg5[%c0_184, %c0_185, %c544] : memref<1x4x1024xf32, #tpu.memory_space<vmem>>, vector<1x4x32xf32>
    %230 = vector.shape_cast %229 : vector<1x4x32xf32> to vector<4x32xf32>
    %231 = vector.shape_cast %228 : vector<4x32xf32> to vector<1x4x32xf32>
    tpu.vector_store %arg5[%c0_184, %c0_185, %c544], %231 {strides = array<i32>} : memref<1x4x1024xf32, #tpu.memory_space<vmem>>, vector<1x4x32xf32>,
    %232 = vector.extract_strided_slice %6 {offsets = [0, 144], sizes = [16, 16], strides = [1, 1]} : vector<16x256xf32> to vector<16x16xf32>
    %233 = vector.extract_strided_slice %232 {offsets = [0, 0], sizes = [4, 16], strides = [1, 1]} : vector<16x16xf32> to vector<4x16xf32>
    %c0_186 = arith.constant 0 : index
    %c0_187 = arith.constant 0 : index
    %c0_188 = arith.constant 0 : index
    %234 = vector.load %arg4[%c0_186, %c0_187, %c0_188] : memref<2x16x32xf32, #tpu.memory_space<vmem>>, vector<1x16x32xf32>
    %235 = vector.shape_cast %234 : vector<1x16x32xf32> to vector<16x32xf32>
    %cst_189 = arith.constant dense<0.000000e+00> : vector<4x32xf32>
    %236 = tpu.matmul %233, %235, %cst_189 {dimension_numbers = #tpu.dot_dimension_numbers<[1], [0], [0], [1], [0, 0, 1, 1], [], []>} : vector<4x16xf32>, vector<16x32xf32>, vector<4x32xf32> -> vector<4x32xf32>
    %237 = vector.extract_strided_slice %232 {offsets = [4, 0], sizes = [4, 16], strides = [1, 1]} : vector<16x16xf32> to vector<4x16xf32>
    %c1_190 = arith.constant 1 : index
    %c0_191 = arith.constant 0 : index
    %c0_192 = arith.constant 0 : index
    %238 = vector.load %arg4[%c1_190, %c0_191, %c0_192] : memref<2x16x32xf32, #tpu.memory_space<vmem>>, vector<1x16x32xf32>
    %239 = vector.shape_cast %238 : vector<1x16x32xf32> to vector<16x32xf32>
    %cst_193 = arith.constant dense<0.000000e+00> : vector<4x32xf32>
    %240 = tpu.matmul %237, %239, %cst_193 {dimension_numbers = #tpu.dot_dimension_numbers<[1], [0], [0], [1], [0, 0, 1, 1], [], []>} : vector<4x16xf32>, vector<16x32xf32>, vector<4x32xf32> -> vector<4x32xf32>
    %241 = arith.addf %236, %240 : vector<4x32xf32>
    %c0_194 = arith.constant 0 : index
    %c0_195 = arith.constant 0 : index
    %c576 = arith.constant 576 : index
    %242 = vector.load %arg5[%c0_194, %c0_195, %c576] : memref<1x4x1024xf32, #tpu.memory_space<vmem>>, vector<1x4x32xf32>
    %243 = vector.shape_cast %242 : vector<1x4x32xf32> to vector<4x32xf32>
    %244 = vector.shape_cast %241 : vector<4x32xf32> to vector<1x4x32xf32>
    tpu.vector_store %arg5[%c0_194, %c0_195, %c576], %244 {strides = array<i32>} : memref<1x4x1024xf32, #tpu.memory_space<vmem>>, vector<1x4x32xf32>,
    %245 = vector.extract_strided_slice %232 {offsets = [8, 0], sizes = [4, 16], strides = [1, 1]} : vector<16x16xf32> to vector<4x16xf32>
    %c0_196 = arith.constant 0 : index
    %c0_197 = arith.constant 0 : index
    %c0_198 = arith.constant 0 : index
    %246 = vector.load %arg4[%c0_196, %c0_197, %c0_198] : memref<2x16x32xf32, #tpu.memory_space<vmem>>, vector<1x16x32xf32>
    %247 = vector.shape_cast %246 : vector<1x16x32xf32> to vector<16x32xf32>
    %cst_199 = arith.constant dense<0.000000e+00> : vector<4x32xf32>
    %248 = tpu.matmul %245, %247, %cst_199 {dimension_numbers = #tpu.dot_dimension_numbers<[1], [0], [0], [1], [0, 0, 1, 1], [], []>} : vector<4x16xf32>, vector<16x32xf32>, vector<4x32xf32> -> vector<4x32xf32>
    %249 = vector.extract_strided_slice %232 {offsets = [12, 0], sizes = [4, 16], strides = [1, 1]} : vector<16x16xf32> to vector<4x16xf32>
    %c1_200 = arith.constant 1 : index
    %c0_201 = arith.constant 0 : index
    %c0_202 = arith.constant 0 : index
    %250 = vector.load %arg4[%c1_200, %c0_201, %c0_202] : memref<2x16x32xf32, #tpu.memory_space<vmem>>, vector<1x16x32xf32>
    %251 = vector.shape_cast %250 : vector<1x16x32xf32> to vector<16x32xf32>
    %cst_203 = arith.constant dense<0.000000e+00> : vector<4x32xf32>
    %252 = tpu.matmul %249, %251, %cst_203 {dimension_numbers = #tpu.dot_dimension_numbers<[1], [0], [0], [1], [0, 0, 1, 1], [], []>} : vector<4x16xf32>, vector<16x32xf32>, vector<4x32xf32> -> vector<4x32xf32>
    %253 = arith.addf %248, %252 : vector<4x32xf32>
    %c0_204 = arith.constant 0 : index
    %c0_205 = arith.constant 0 : index
    %c608 = arith.constant 608 : index
    %254 = vector.load %arg5[%c0_204, %c0_205, %c608] : memref<1x4x1024xf32, #tpu.memory_space<vmem>>, vector<1x4x32xf32>
    %255 = vector.shape_cast %254 : vector<1x4x32xf32> to vector<4x32xf32>
    %256 = vector.shape_cast %253 : vector<4x32xf32> to vector<1x4x32xf32>
    tpu.vector_store %arg5[%c0_204, %c0_205, %c608], %256 {strides = array<i32>} : memref<1x4x1024xf32, #tpu.memory_space<vmem>>, vector<1x4x32xf32>,
    %257 = vector.extract_strided_slice %6 {offsets = [0, 160], sizes = [16, 16], strides = [1, 1]} : vector<16x256xf32> to vector<16x16xf32>
    %258 = vector.extract_strided_slice %257 {offsets = [0, 0], sizes = [4, 16], strides = [1, 1]} : vector<16x16xf32> to vector<4x16xf32>
    %c0_206 = arith.constant 0 : index
    %c0_207 = arith.constant 0 : index
    %c0_208 = arith.constant 0 : index
    %259 = vector.load %arg4[%c0_206, %c0_207, %c0_208] : memref<2x16x32xf32, #tpu.memory_space<vmem>>, vector<1x16x32xf32>
    %260 = vector.shape_cast %259 : vector<1x16x32xf32> to vector<16x32xf32>
    %cst_209 = arith.constant dense<0.000000e+00> : vector<4x32xf32>
    %261 = tpu.matmul %258, %260, %cst_209 {dimension_numbers = #tpu.dot_dimension_numbers<[1], [0], [0], [1], [0, 0, 1, 1], [], []>} : vector<4x16xf32>, vector<16x32xf32>, vector<4x32xf32> -> vector<4x32xf32>
    %262 = vector.extract_strided_slice %257 {offsets = [4, 0], sizes = [4, 16], strides = [1, 1]} : vector<16x16xf32> to vector<4x16xf32>
    %c1_210 = arith.constant 1 : index
    %c0_211 = arith.constant 0 : index
    %c0_212 = arith.constant 0 : index
    %263 = vector.load %arg4[%c1_210, %c0_211, %c0_212] : memref<2x16x32xf32, #tpu.memory_space<vmem>>, vector<1x16x32xf32>
    %264 = vector.shape_cast %263 : vector<1x16x32xf32> to vector<16x32xf32>
    %cst_213 = arith.constant dense<0.000000e+00> : vector<4x32xf32>
    %265 = tpu.matmul %262, %264, %cst_213 {dimension_numbers = #tpu.dot_dimension_numbers<[1], [0], [0], [1], [0, 0, 1, 1], [], []>} : vector<4x16xf32>, vector<16x32xf32>, vector<4x32xf32> -> vector<4x32xf32>
    %266 = arith.addf %261, %265 : vector<4x32xf32>
    %c0_214 = arith.constant 0 : index
    %c0_215 = arith.constant 0 : index
    %c640 = arith.constant 640 : index
    %267 = vector.load %arg5[%c0_214, %c0_215, %c640] : memref<1x4x1024xf32, #tpu.memory_space<vmem>>, vector<1x4x32xf32>
    %268 = vector.shape_cast %267 : vector<1x4x32xf32> to vector<4x32xf32>
    %269 = vector.shape_cast %266 : vector<4x32xf32> to vector<1x4x32xf32>
    tpu.vector_store %arg5[%c0_214, %c0_215, %c640], %269 {strides = array<i32>} : memref<1x4x1024xf32, #tpu.memory_space<vmem>>, vector<1x4x32xf32>,
    %270 = vector.extract_strided_slice %257 {offsets = [8, 0], sizes = [4, 16], strides = [1, 1]} : vector<16x16xf32> to vector<4x16xf32>
    %c0_216 = arith.constant 0 : index
    %c0_217 = arith.constant 0 : index
    %c0_218 = arith.constant 0 : index
    %271 = vector.load %arg4[%c0_216, %c0_217, %c0_218] : memref<2x16x32xf32, #tpu.memory_space<vmem>>, vector<1x16x32xf32>
    %272 = vector.shape_cast %271 : vector<1x16x32xf32> to vector<16x32xf32>
    %cst_219 = arith.constant dense<0.000000e+00> : vector<4x32xf32>
    %273 = tpu.matmul %270, %272, %cst_219 {dimension_numbers = #tpu.dot_dimension_numbers<[1], [0], [0], [1], [0, 0, 1, 1], [], []>} : vector<4x16xf32>, vector<16x32xf32>, vector<4x32xf32> -> vector<4x32xf32>
    %274 = vector.extract_strided_slice %257 {offsets = [12, 0], sizes = [4, 16], strides = [1, 1]} : vector<16x16xf32> to vector<4x16xf32>
    %c1_220 = arith.constant 1 : index
    %c0_221 = arith.constant 0 : index
    %c0_222 = arith.constant 0 : index
    %275 = vector.load %arg4[%c1_220, %c0_221, %c0_222] : memref<2x16x32xf32, #tpu.memory_space<vmem>>, vector<1x16x32xf32>
    %276 = vector.shape_cast %275 : vector<1x16x32xf32> to vector<16x32xf32>
    %cst_223 = arith.constant dense<0.000000e+00> : vector<4x32xf32>
    %277 = tpu.matmul %274, %276, %cst_223 {dimension_numbers = #tpu.dot_dimension_numbers<[1], [0], [0], [1], [0, 0, 1, 1], [], []>} : vector<4x16xf32>, vector<16x32xf32>, vector<4x32xf32> -> vector<4x32xf32>
    %278 = arith.addf %273, %277 : vector<4x32xf32>
    %c0_224 = arith.constant 0 : index
    %c0_225 = arith.constant 0 : index
    %c672 = arith.constant 672 : index
    %279 = vector.load %arg5[%c0_224, %c0_225, %c672] : memref<1x4x1024xf32, #tpu.memory_space<vmem>>, vector<1x4x32xf32>
    %280 = vector.shape_cast %279 : vector<1x4x32xf32> to vector<4x32xf32>
    %281 = vector.shape_cast %278 : vector<4x32xf32> to vector<1x4x32xf32>
    tpu.vector_store %arg5[%c0_224, %c0_225, %c672], %281 {strides = array<i32>} : memref<1x4x1024xf32, #tpu.memory_space<vmem>>, vector<1x4x32xf32>,
    %282 = vector.extract_strided_slice %6 {offsets = [0, 176], sizes = [16, 16], strides = [1, 1]} : vector<16x256xf32> to vector<16x16xf32>
    %283 = vector.extract_strided_slice %282 {offsets = [0, 0], sizes = [4, 16], strides = [1, 1]} : vector<16x16xf32> to vector<4x16xf32>
    %c0_226 = arith.constant 0 : index
    %c0_227 = arith.constant 0 : index
    %c0_228 = arith.constant 0 : index
    %284 = vector.load %arg4[%c0_226, %c0_227, %c0_228] : memref<2x16x32xf32, #tpu.memory_space<vmem>>, vector<1x16x32xf32>
    %285 = vector.shape_cast %284 : vector<1x16x32xf32> to vector<16x32xf32>
    %cst_229 = arith.constant dense<0.000000e+00> : vector<4x32xf32>
    %286 = tpu.matmul %283, %285, %cst_229 {dimension_numbers = #tpu.dot_dimension_numbers<[1], [0], [0], [1], [0, 0, 1, 1], [], []>} : vector<4x16xf32>, vector<16x32xf32>, vector<4x32xf32> -> vector<4x32xf32>
    %287 = vector.extract_strided_slice %282 {offsets = [4, 0], sizes = [4, 16], strides = [1, 1]} : vector<16x16xf32> to vector<4x16xf32>
    %c1_230 = arith.constant 1 : index
    %c0_231 = arith.constant 0 : index
    %c0_232 = arith.constant 0 : index
    %288 = vector.load %arg4[%c1_230, %c0_231, %c0_232] : memref<2x16x32xf32, #tpu.memory_space<vmem>>, vector<1x16x32xf32>
    %289 = vector.shape_cast %288 : vector<1x16x32xf32> to vector<16x32xf32>
    %cst_233 = arith.constant dense<0.000000e+00> : vector<4x32xf32>
    %290 = tpu.matmul %287, %289, %cst_233 {dimension_numbers = #tpu.dot_dimension_numbers<[1], [0], [0], [1], [0, 0, 1, 1], [], []>} : vector<4x16xf32>, vector<16x32xf32>, vector<4x32xf32> -> vector<4x32xf32>
    %291 = arith.addf %286, %290 : vector<4x32xf32>
    %c0_234 = arith.constant 0 : index
    %c0_235 = arith.constant 0 : index
    %c704 = arith.constant 704 : index
    %292 = vector.load %arg5[%c0_234, %c0_235, %c704] : memref<1x4x1024xf32, #tpu.memory_space<vmem>>, vector<1x4x32xf32>
    %293 = vector.shape_cast %292 : vector<1x4x32xf32> to vector<4x32xf32>
    %294 = vector.shape_cast %291 : vector<4x32xf32> to vector<1x4x32xf32>
    tpu.vector_store %arg5[%c0_234, %c0_235, %c704], %294 {strides = array<i32>} : memref<1x4x1024xf32, #tpu.memory_space<vmem>>, vector<1x4x32xf32>,
    %295 = vector.extract_strided_slice %282 {offsets = [8, 0], sizes = [4, 16], strides = [1, 1]} : vector<16x16xf32> to vector<4x16xf32>
    %c0_236 = arith.constant 0 : index
    %c0_237 = arith.constant 0 : index
    %c0_238 = arith.constant 0 : index
    %296 = vector.load %arg4[%c0_236, %c0_237, %c0_238] : memref<2x16x32xf32, #tpu.memory_space<vmem>>, vector<1x16x32xf32>
    %297 = vector.shape_cast %296 : vector<1x16x32xf32> to vector<16x32xf32>
    %cst_239 = arith.constant dense<0.000000e+00> : vector<4x32xf32>
    %298 = tpu.matmul %295, %297, %cst_239 {dimension_numbers = #tpu.dot_dimension_numbers<[1], [0], [0], [1], [0, 0, 1, 1], [], []>} : vector<4x16xf32>, vector<16x32xf32>, vector<4x32xf32> -> vector<4x32xf32>
    %299 = vector.extract_strided_slice %282 {offsets = [12, 0], sizes = [4, 16], strides = [1, 1]} : vector<16x16xf32> to vector<4x16xf32>
    %c1_240 = arith.constant 1 : index
    %c0_241 = arith.constant 0 : index
    %c0_242 = arith.constant 0 : index
    %300 = vector.load %arg4[%c1_240, %c0_241, %c0_242] : memref<2x16x32xf32, #tpu.memory_space<vmem>>, vector<1x16x32xf32>
    %301 = vector.shape_cast %300 : vector<1x16x32xf32> to vector<16x32xf32>
    %cst_243 = arith.constant dense<0.000000e+00> : vector<4x32xf32>
    %302 = tpu.matmul %299, %301, %cst_243 {dimension_numbers = #tpu.dot_dimension_numbers<[1], [0], [0], [1], [0, 0, 1, 1], [], []>} : vector<4x16xf32>, vector<16x32xf32>, vector<4x32xf32> -> vector<4x32xf32>
    %303 = arith.addf %298, %302 : vector<4x32xf32>
    %c0_244 = arith.constant 0 : index
    %c0_245 = arith.constant 0 : index
    %c736 = arith.constant 736 : index
    %304 = vector.load %arg5[%c0_244, %c0_245, %c736] : memref<1x4x1024xf32, #tpu.memory_space<vmem>>, vector<1x4x32xf32>
    %305 = vector.shape_cast %304 : vector<1x4x32xf32> to vector<4x32xf32>
    %306 = vector.shape_cast %303 : vector<4x32xf32> to vector<1x4x32xf32>
    tpu.vector_store %arg5[%c0_244, %c0_245, %c736], %306 {strides = array<i32>} : memref<1x4x1024xf32, #tpu.memory_space<vmem>>, vector<1x4x32xf32>,
    %307 = vector.extract_strided_slice %6 {offsets = [0, 192], sizes = [16, 16], strides = [1, 1]} : vector<16x256xf32> to vector<16x16xf32>
    %308 = vector.extract_strided_slice %307 {offsets = [0, 0], sizes = [4, 16], strides = [1, 1]} : vector<16x16xf32> to vector<4x16xf32>
    %c0_246 = arith.constant 0 : index
    %c0_247 = arith.constant 0 : index
    %c0_248 = arith.constant 0 : index
    %309 = vector.load %arg4[%c0_246, %c0_247, %c0_248] : memref<2x16x32xf32, #tpu.memory_space<vmem>>, vector<1x16x32xf32>
    %310 = vector.shape_cast %309 : vector<1x16x32xf32> to vector<16x32xf32>
    %cst_249 = arith.constant dense<0.000000e+00> : vector<4x32xf32>
    %311 = tpu.matmul %308, %310, %cst_249 {dimension_numbers = #tpu.dot_dimension_numbers<[1], [0], [0], [1], [0, 0, 1, 1], [], []>} : vector<4x16xf32>, vector<16x32xf32>, vector<4x32xf32> -> vector<4x32xf32>
    %312 = vector.extract_strided_slice %307 {offsets = [4, 0], sizes = [4, 16], strides = [1, 1]} : vector<16x16xf32> to vector<4x16xf32>
    %c1_250 = arith.constant 1 : index
    %c0_251 = arith.constant 0 : index
    %c0_252 = arith.constant 0 : index
    %313 = vector.load %arg4[%c1_250, %c0_251, %c0_252] : memref<2x16x32xf32, #tpu.memory_space<vmem>>, vector<1x16x32xf32>
    %314 = vector.shape_cast %313 : vector<1x16x32xf32> to vector<16x32xf32>
    %cst_253 = arith.constant dense<0.000000e+00> : vector<4x32xf32>
    %315 = tpu.matmul %312, %314, %cst_253 {dimension_numbers = #tpu.dot_dimension_numbers<[1], [0], [0], [1], [0, 0, 1, 1], [], []>} : vector<4x16xf32>, vector<16x32xf32>, vector<4x32xf32> -> vector<4x32xf32>
    %316 = arith.addf %311, %315 : vector<4x32xf32>
    %c0_254 = arith.constant 0 : index
    %c0_255 = arith.constant 0 : index
    %c768 = arith.constant 768 : index
    %317 = vector.load %arg5[%c0_254, %c0_255, %c768] : memref<1x4x1024xf32, #tpu.memory_space<vmem>>, vector<1x4x32xf32>
    %318 = vector.shape_cast %317 : vector<1x4x32xf32> to vector<4x32xf32>
    %319 = vector.shape_cast %316 : vector<4x32xf32> to vector<1x4x32xf32>
    tpu.vector_store %arg5[%c0_254, %c0_255, %c768], %319 {strides = array<i32>} : memref<1x4x1024xf32, #tpu.memory_space<vmem>>, vector<1x4x32xf32>,
    %320 = vector.extract_strided_slice %307 {offsets = [8, 0], sizes = [4, 16], strides = [1, 1]} : vector<16x16xf32> to vector<4x16xf32>
    %c0_256 = arith.constant 0 : index
    %c0_257 = arith.constant 0 : index
    %c0_258 = arith.constant 0 : index
    %321 = vector.load %arg4[%c0_256, %c0_257, %c0_258] : memref<2x16x32xf32, #tpu.memory_space<vmem>>, vector<1x16x32xf32>
    %322 = vector.shape_cast %321 : vector<1x16x32xf32> to vector<16x32xf32>
    %cst_259 = arith.constant dense<0.000000e+00> : vector<4x32xf32>
    %323 = tpu.matmul %320, %322, %cst_259 {dimension_numbers = #tpu.dot_dimension_numbers<[1], [0], [0], [1], [0, 0, 1, 1], [], []>} : vector<4x16xf32>, vector<16x32xf32>, vector<4x32xf32> -> vector<4x32xf32>
    %324 = vector.extract_strided_slice %307 {offsets = [12, 0], sizes = [4, 16], strides = [1, 1]} : vector<16x16xf32> to vector<4x16xf32>
    %c1_260 = arith.constant 1 : index
    %c0_261 = arith.constant 0 : index
    %c0_262 = arith.constant 0 : index
    %325 = vector.load %arg4[%c1_260, %c0_261, %c0_262] : memref<2x16x32xf32, #tpu.memory_space<vmem>>, vector<1x16x32xf32>
    %326 = vector.shape_cast %325 : vector<1x16x32xf32> to vector<16x32xf32>
    %cst_263 = arith.constant dense<0.000000e+00> : vector<4x32xf32>
    %327 = tpu.matmul %324, %326, %cst_263 {dimension_numbers = #tpu.dot_dimension_numbers<[1], [0], [0], [1], [0, 0, 1, 1], [], []>} : vector<4x16xf32>, vector<16x32xf32>, vector<4x32xf32> -> vector<4x32xf32>
    %328 = arith.addf %323, %327 : vector<4x32xf32>
    %c0_264 = arith.constant 0 : index
    %c0_265 = arith.constant 0 : index
    %c800 = arith.constant 800 : index
    %329 = vector.load %arg5[%c0_264, %c0_265, %c800] : memref<1x4x1024xf32, #tpu.memory_space<vmem>>, vector<1x4x32xf32>
    %330 = vector.shape_cast %329 : vector<1x4x32xf32> to vector<4x32xf32>
    %331 = vector.shape_cast %328 : vector<4x32xf32> to vector<1x4x32xf32>
    tpu.vector_store %arg5[%c0_264, %c0_265, %c800], %331 {strides = array<i32>} : memref<1x4x1024xf32, #tpu.memory_space<vmem>>, vector<1x4x32xf32>,
    %332 = vector.extract_strided_slice %6 {offsets = [0, 208], sizes = [16, 16], strides = [1, 1]} : vector<16x256xf32> to vector<16x16xf32>
    %333 = vector.extract_strided_slice %332 {offsets = [0, 0], sizes = [4, 16], strides = [1, 1]} : vector<16x16xf32> to vector<4x16xf32>
    %c0_266 = arith.constant 0 : index
    %c0_267 = arith.constant 0 : index
    %c0_268 = arith.constant 0 : index
    %334 = vector.load %arg4[%c0_266, %c0_267, %c0_268] : memref<2x16x32xf32, #tpu.memory_space<vmem>>, vector<1x16x32xf32>
    %335 = vector.shape_cast %334 : vector<1x16x32xf32> to vector<16x32xf32>
    %cst_269 = arith.constant dense<0.000000e+00> : vector<4x32xf32>
    %336 = tpu.matmul %333, %335, %cst_269 {dimension_numbers = #tpu.dot_dimension_numbers<[1], [0], [0], [1], [0, 0, 1, 1], [], []>} : vector<4x16xf32>, vector<16x32xf32>, vector<4x32xf32> -> vector<4x32xf32>
    %337 = vector.extract_strided_slice %332 {offsets = [4, 0], sizes = [4, 16], strides = [1, 1]} : vector<16x16xf32> to vector<4x16xf32>
    %c1_270 = arith.constant 1 : index
    %c0_271 = arith.constant 0 : index
    %c0_272 = arith.constant 0 : index
    %338 = vector.load %arg4[%c1_270, %c0_271, %c0_272] : memref<2x16x32xf32, #tpu.memory_space<vmem>>, vector<1x16x32xf32>
    %339 = vector.shape_cast %338 : vector<1x16x32xf32> to vector<16x32xf32>
    %cst_273 = arith.constant dense<0.000000e+00> : vector<4x32xf32>
    %340 = tpu.matmul %337, %339, %cst_273 {dimension_numbers = #tpu.dot_dimension_numbers<[1], [0], [0], [1], [0, 0, 1, 1], [], []>} : vector<4x16xf32>, vector<16x32xf32>, vector<4x32xf32> -> vector<4x32xf32>
    %341 = arith.addf %336, %340 : vector<4x32xf32>
    %c0_274 = arith.constant 0 : index
    %c0_275 = arith.constant 0 : index
    %c832 = arith.constant 832 : index
    %342 = vector.load %arg5[%c0_274, %c0_275, %c832] : memref<1x4x1024xf32, #tpu.memory_space<vmem>>, vector<1x4x32xf32>
    %343 = vector.shape_cast %342 : vector<1x4x32xf32> to vector<4x32xf32>
    %344 = vector.shape_cast %341 : vector<4x32xf32> to vector<1x4x32xf32>
    tpu.vector_store %arg5[%c0_274, %c0_275, %c832], %344 {strides = array<i32>} : memref<1x4x1024xf32, #tpu.memory_space<vmem>>, vector<1x4x32xf32>,
    %345 = vector.extract_strided_slice %332 {offsets = [8, 0], sizes = [4, 16], strides = [1, 1]} : vector<16x16xf32> to vector<4x16xf32>
    %c0_276 = arith.constant 0 : index
    %c0_277 = arith.constant 0 : index
    %c0_278 = arith.constant 0 : index
    %346 = vector.load %arg4[%c0_276, %c0_277, %c0_278] : memref<2x16x32xf32, #tpu.memory_space<vmem>>, vector<1x16x32xf32>
    %347 = vector.shape_cast %346 : vector<1x16x32xf32> to vector<16x32xf32>
    %cst_279 = arith.constant dense<0.000000e+00> : vector<4x32xf32>
    %348 = tpu.matmul %345, %347, %cst_279 {dimension_numbers = #tpu.dot_dimension_numbers<[1], [0], [0], [1], [0, 0, 1, 1], [], []>} : vector<4x16xf32>, vector<16x32xf32>, vector<4x32xf32> -> vector<4x32xf32>
    %349 = vector.extract_strided_slice %332 {offsets = [12, 0], sizes = [4, 16], strides = [1, 1]} : vector<16x16xf32> to vector<4x16xf32>
    %c1_280 = arith.constant 1 : index
    %c0_281 = arith.constant 0 : index
    %c0_282 = arith.constant 0 : index
    %350 = vector.load %arg4[%c1_280, %c0_281, %c0_282] : memref<2x16x32xf32, #tpu.memory_space<vmem>>, vector<1x16x32xf32>
    %351 = vector.shape_cast %350 : vector<1x16x32xf32> to vector<16x32xf32>
    %cst_283 = arith.constant dense<0.000000e+00> : vector<4x32xf32>
    %352 = tpu.matmul %349, %351, %cst_283 {dimension_numbers = #tpu.dot_dimension_numbers<[1], [0], [0], [1], [0, 0, 1, 1], [], []>} : vector<4x16xf32>, vector<16x32xf32>, vector<4x32xf32> -> vector<4x32xf32>
    %353 = arith.addf %348, %352 : vector<4x32xf32>
    %c0_284 = arith.constant 0 : index
    %c0_285 = arith.constant 0 : index
    %c864 = arith.constant 864 : index
    %354 = vector.load %arg5[%c0_284, %c0_285, %c864] : memref<1x4x1024xf32, #tpu.memory_space<vmem>>, vector<1x4x32xf32>
    %355 = vector.shape_cast %354 : vector<1x4x32xf32> to vector<4x32xf32>
    %356 = vector.shape_cast %353 : vector<4x32xf32> to vector<1x4x32xf32>
    tpu.vector_store %arg5[%c0_284, %c0_285, %c864], %356 {strides = array<i32>} : memref<1x4x1024xf32, #tpu.memory_space<vmem>>, vector<1x4x32xf32>,
    %357 = vector.extract_strided_slice %6 {offsets = [0, 224], sizes = [16, 16], strides = [1, 1]} : vector<16x256xf32> to vector<16x16xf32>
    %358 = vector.extract_strided_slice %357 {offsets = [0, 0], sizes = [4, 16], strides = [1, 1]} : vector<16x16xf32> to vector<4x16xf32>
    %c0_286 = arith.constant 0 : index
    %c0_287 = arith.constant 0 : index
    %c0_288 = arith.constant 0 : index
    %359 = vector.load %arg4[%c0_286, %c0_287, %c0_288] : memref<2x16x32xf32, #tpu.memory_space<vmem>>, vector<1x16x32xf32>
    %360 = vector.shape_cast %359 : vector<1x16x32xf32> to vector<16x32xf32>
    %cst_289 = arith.constant dense<0.000000e+00> : vector<4x32xf32>
    %361 = tpu.matmul %358, %360, %cst_289 {dimension_numbers = #tpu.dot_dimension_numbers<[1], [0], [0], [1], [0, 0, 1, 1], [], []>} : vector<4x16xf32>, vector<16x32xf32>, vector<4x32xf32> -> vector<4x32xf32>
    %362 = vector.extract_strided_slice %357 {offsets = [4, 0], sizes = [4, 16], strides = [1, 1]} : vector<16x16xf32> to vector<4x16xf32>
    %c1_290 = arith.constant 1 : index
    %c0_291 = arith.constant 0 : index
    %c0_292 = arith.constant 0 : index
    %363 = vector.load %arg4[%c1_290, %c0_291, %c0_292] : memref<2x16x32xf32, #tpu.memory_space<vmem>>, vector<1x16x32xf32>
    %364 = vector.shape_cast %363 : vector<1x16x32xf32> to vector<16x32xf32>
    %cst_293 = arith.constant dense<0.000000e+00> : vector<4x32xf32>
    %365 = tpu.matmul %362, %364, %cst_293 {dimension_numbers = #tpu.dot_dimension_numbers<[1], [0], [0], [1], [0, 0, 1, 1], [], []>} : vector<4x16xf32>, vector<16x32xf32>, vector<4x32xf32> -> vector<4x32xf32>
    %366 = arith.addf %361, %365 : vector<4x32xf32>
    %c0_294 = arith.constant 0 : index
    %c0_295 = arith.constant 0 : index
    %c896 = arith.constant 896 : index
    %367 = vector.load %arg5[%c0_294, %c0_295, %c896] : memref<1x4x1024xf32, #tpu.memory_space<vmem>>, vector<1x4x32xf32>
    %368 = vector.shape_cast %367 : vector<1x4x32xf32> to vector<4x32xf32>
    %369 = vector.shape_cast %366 : vector<4x32xf32> to vector<1x4x32xf32>
    tpu.vector_store %arg5[%c0_294, %c0_295, %c896], %369 {strides = array<i32>} : memref<1x4x1024xf32, #tpu.memory_space<vmem>>, vector<1x4x32xf32>,
    %370 = vector.extract_strided_slice %357 {offsets = [8, 0], sizes = [4, 16], strides = [1, 1]} : vector<16x16xf32> to vector<4x16xf32>
    %c0_296 = arith.constant 0 : index
    %c0_297 = arith.constant 0 : index
    %c0_298 = arith.constant 0 : index
    %371 = vector.load %arg4[%c0_296, %c0_297, %c0_298] : memref<2x16x32xf32, #tpu.memory_space<vmem>>, vector<1x16x32xf32>
    %372 = vector.shape_cast %371 : vector<1x16x32xf32> to vector<16x32xf32>
    %cst_299 = arith.constant dense<0.000000e+00> : vector<4x32xf32>
    %373 = tpu.matmul %370, %372, %cst_299 {dimension_numbers = #tpu.dot_dimension_numbers<[1], [0], [0], [1], [0, 0, 1, 1], [], []>} : vector<4x16xf32>, vector<16x32xf32>, vector<4x32xf32> -> vector<4x32xf32>
    %374 = vector.extract_strided_slice %357 {offsets = [12, 0], sizes = [4, 16], strides = [1, 1]} : vector<16x16xf32> to vector<4x16xf32>
    %c1_300 = arith.constant 1 : index
    %c0_301 = arith.constant 0 : index
    %c0_302 = arith.constant 0 : index
    %375 = vector.load %arg4[%c1_300, %c0_301, %c0_302] : memref<2x16x32xf32, #tpu.memory_space<vmem>>, vector<1x16x32xf32>
    %376 = vector.shape_cast %375 : vector<1x16x32xf32> to vector<16x32xf32>
    %cst_303 = arith.constant dense<0.000000e+00> : vector<4x32xf32>
    %377 = tpu.matmul %374, %376, %cst_303 {dimension_numbers = #tpu.dot_dimension_numbers<[1], [0], [0], [1], [0, 0, 1, 1], [], []>} : vector<4x16xf32>, vector<16x32xf32>, vector<4x32xf32> -> vector<4x32xf32>
    %378 = arith.addf %373, %377 : vector<4x32xf32>
    %c0_304 = arith.constant 0 : index
    %c0_305 = arith.constant 0 : index
    %c928 = arith.constant 928 : index
    %379 = vector.load %arg5[%c0_304, %c0_305, %c928] : memref<1x4x1024xf32, #tpu.memory_space<vmem>>, vector<1x4x32xf32>
    %380 = vector.shape_cast %379 : vector<1x4x32xf32> to vector<4x32xf32>
    %381 = vector.shape_cast %378 : vector<4x32xf32> to vector<1x4x32xf32>
    tpu.vector_store %arg5[%c0_304, %c0_305, %c928], %381 {strides = array<i32>} : memref<1x4x1024xf32, #tpu.memory_space<vmem>>, vector<1x4x32xf32>,
    %382 = vector.extract_strided_slice %6 {offsets = [0, 240], sizes = [16, 16], strides = [1, 1]} : vector<16x256xf32> to vector<16x16xf32>
    %383 = vector.extract_strided_slice %382 {offsets = [0, 0], sizes = [4, 16], strides = [1, 1]} : vector<16x16xf32> to vector<4x16xf32>
    %c0_306 = arith.constant 0 : index
    %c0_307 = arith.constant 0 : index
    %c0_308 = arith.constant 0 : index
    %384 = vector.load %arg4[%c0_306, %c0_307, %c0_308] : memref<2x16x32xf32, #tpu.memory_space<vmem>>, vector<1x16x32xf32>
    %385 = vector.shape_cast %384 : vector<1x16x32xf32> to vector<16x32xf32>
    %cst_309 = arith.constant dense<0.000000e+00> : vector<4x32xf32>
    %386 = tpu.matmul %383, %385, %cst_309 {dimension_numbers = #tpu.dot_dimension_numbers<[1], [0], [0], [1], [0, 0, 1, 1], [], []>} : vector<4x16xf32>, vector<16x32xf32>, vector<4x32xf32> -> vector<4x32xf32>
    %387 = vector.extract_strided_slice %382 {offsets = [4, 0], sizes = [4, 16], strides = [1, 1]} : vector<16x16xf32> to vector<4x16xf32>
    %c1_310 = arith.constant 1 : index
    %c0_311 = arith.constant 0 : index
    %c0_312 = arith.constant 0 : index
    %388 = vector.load %arg4[%c1_310, %c0_311, %c0_312] : memref<2x16x32xf32, #tpu.memory_space<vmem>>, vector<1x16x32xf32>
    %389 = vector.shape_cast %388 : vector<1x16x32xf32> to vector<16x32xf32>
    %cst_313 = arith.constant dense<0.000000e+00> : vector<4x32xf32>
    %390 = tpu.matmul %387, %389, %cst_313 {dimension_numbers = #tpu.dot_dimension_numbers<[1], [0], [0], [1], [0, 0, 1, 1], [], []>} : vector<4x16xf32>, vector<16x32xf32>, vector<4x32xf32> -> vector<4x32xf32>
    %391 = arith.addf %386, %390 : vector<4x32xf32>
    %c0_314 = arith.constant 0 : index
    %c0_315 = arith.constant 0 : index
    %c960 = arith.constant 960 : index
    %392 = vector.load %arg5[%c0_314, %c0_315, %c960] : memref<1x4x1024xf32, #tpu.memory_space<vmem>>, vector<1x4x32xf32>
    %393 = vector.shape_cast %392 : vector<1x4x32xf32> to vector<4x32xf32>
    %394 = vector.shape_cast %391 : vector<4x32xf32> to vector<1x4x32xf32>
    tpu.vector_store %arg5[%c0_314, %c0_315, %c960], %394 {strides = array<i32>} : memref<1x4x1024xf32, #tpu.memory_space<vmem>>, vector<1x4x32xf32>,
    %395 = vector.extract_strided_slice %382 {offsets = [8, 0], sizes = [4, 16], strides = [1, 1]} : vector<16x16xf32> to vector<4x16xf32>
    %c0_316 = arith.constant 0 : index
    %c0_317 = arith.constant 0 : index
    %c0_318 = arith.constant 0 : index
    %396 = vector.load %arg4[%c0_316, %c0_317, %c0_318] : memref<2x16x32xf32, #tpu.memory_space<vmem>>, vector<1x16x32xf32>
    %397 = vector.shape_cast %396 : vector<1x16x32xf32> to vector<16x32xf32>
    %cst_319 = arith.constant dense<0.000000e+00> : vector<4x32xf32>
    %398 = tpu.matmul %395, %397, %cst_319 {dimension_numbers = #tpu.dot_dimension_numbers<[1], [0], [0], [1], [0, 0, 1, 1], [], []>} : vector<4x16xf32>, vector<16x32xf32>, vector<4x32xf32> -> vector<4x32xf32>
    %399 = vector.extract_strided_slice %382 {offsets = [12, 0], sizes = [4, 16], strides = [1, 1]} : vector<16x16xf32> to vector<4x16xf32>
    %c1_320 = arith.constant 1 : index
    %c0_321 = arith.constant 0 : index
    %c0_322 = arith.constant 0 : index
    %400 = vector.load %arg4[%c1_320, %c0_321, %c0_322] : memref<2x16x32xf32, #tpu.memory_space<vmem>>, vector<1x16x32xf32>
    %401 = vector.shape_cast %400 : vector<1x16x32xf32> to vector<16x32xf32>
    %cst_323 = arith.constant dense<0.000000e+00> : vector<4x32xf32>
    %402 = tpu.matmul %399, %401, %cst_323 {dimension_numbers = #tpu.dot_dimension_numbers<[1], [0], [0], [1], [0, 0, 1, 1], [], []>} : vector<4x16xf32>, vector<16x32xf32>, vector<4x32xf32> -> vector<4x32xf32>
    %403 = arith.addf %398, %402 : vector<4x32xf32>
    %c0_324 = arith.constant 0 : index
    %c0_325 = arith.constant 0 : index
    %c992 = arith.constant 992 : index
    %404 = vector.load %arg5[%c0_324, %c0_325, %c992] : memref<1x4x1024xf32, #tpu.memory_space<vmem>>, vector<1x4x32xf32>
    %405 = vector.shape_cast %404 : vector<1x4x32xf32> to vector<4x32xf32>
    %406 = vector.shape_cast %403 : vector<4x32xf32> to vector<1x4x32xf32>
    tpu.vector_store %arg5[%c0_324, %c0_325, %c992], %406 {strides = array<i32>} : memref<1x4x1024xf32, #tpu.memory_space<vmem>>, vector<1x4x32xf32>,
    return
  }
  func.func @transform_0(%arg0: i32) -> (i32, i32, i32) {
    %c0_i32 = arith.constant 0 : i32
    %c0_i32_0 = arith.constant 0 : i32
    %c0_i32_1 = arith.constant 0 : i32
    return %arg0, %c0_i32, %c0_i32_0 : i32, i32, i32
  }
  func.func @transform_1(%arg0: i32) -> (i32, i32) {
    %c0_i32 = arith.constant 0 : i32
    %c0_i32_0 = arith.constant 0 : i32
    %c0_i32_1 = arith.constant 0 : i32
    return %c0_i32, %c0_i32_0 : i32, i32
  }
  func.func @transform_2(%arg0: i32) -> (i32, i32) {
    %c0_i32 = arith.constant 0 : i32
    %c0_i32_0 = arith.constant 0 : i32
    %c0_i32_1 = arith.constant 0 : i32
    return %c0_i32, %c0_i32_0 : i32, i32
  }
  func.func @transform_3(%arg0: i32) -> (i32, i32, i32) {
    %c0_i32 = arith.constant 0 : i32
    %c0_i32_0 = arith.constant 0 : i32
    %c0_i32_1 = arith.constant 0 : i32
    %c0_i32_2 = arith.constant 0 : i32
    return %c0_i32, %c0_i32_0, %c0_i32_1 : i32, i32, i32
  }
  func.func @transform_4(%arg0: i32) -> (i32, i32, i32) {
    %c0_i32 = arith.constant 0 : i32
    %c0_i32_0 = arith.constant 0 : i32
    %c0_i32_1 = arith.constant 0 : i32
    return %arg0, %c0_i32, %c0_i32_0 : i32, i32, i32
  }
}

</mosaic_0001>

<bundles_post_ra>
// kernel: tpu_custom_call.1
= control target key start
LH: loop header
LB: loop body
LE: loop exit
PB: predicated region body
PF: predicated region fallthrough
CT: control target
= control target key end

     0   :  { %9 = vsyncpa [#allocation3], 0  ;;  %s3047_s0 = inlined_call_operand.hbm [shape: f32[2,4,256], index: 0, kind: input, shape index: {}]   ;;  %s3048_s1 = inlined_call_operand.vmem [shape: f32[16,4], index: 1, kind: input, shape index: {}]   ;;  %s3049_s2 = inlined_call_operand.vmem [shape: f32[16,1], index: 2, kind: input, shape index: {}]   ;;  %s3050_s3 = inlined_call_operand.vmem [shape: f32[2,16,32], index: 3, kind: input, shape index: {}]   ;;  %s3051_s4 = inlined_call_operand.hbm [shape: f32[2,4,1024], index: 4, kind: output, shape index: {}]  }
   0x1   :  { %11 = vsyncpa [#allocation3 + $0x1], 0 }
   0x2   :  { %12 = vsyncpa [#allocation4], 0 }
   0x3   :  { %14 = vsyncpa [#allocation4 + $0x1], 0  ;;  %s2506_s15 = smov 0   ;;  %s2508_s16 = smov 0  }
   0x4   :  { %s2510_s17 = smov 0   ;;  %s2512_s18 = smov 0  }
   0x5 LB: > { %s2527_s19 = sadd.s32 4294967295, %s2471_s18   ;;  %s2170_s20 = sadd.s32 4294967294, %s2471_s18   ;;  %s2471_s18 = sphi %s2512_s18, %s3061_s18   ;;  %s2467_s17 = sphi %s2510_s17, %s3060_s17   ;;  %s2463_s16 = sphi %s2508_s16, %s3059_s16   ;;  %s2459_s15 = sphi %s2506_s15, %s3058_s15  }
   0x6   : > { %s2531_s21 = sadd.s32 1, %s2471_s18   ;;  %s27_s22 = sadd.s32 1, %s2467_s17 }
   0x7   : > { %s24_s23 = ssub.s32 %s2471_s18, %s2531_s21  ;;  %p34_p0 = scmp.ne.s32.totalorder %s2467_s17, %s2463_s16 }
   0x8   : > { %p25_p1 = scmp.eq.s32.totalorder %s24_s23, 0  ;;  %p35_p2 = scmp.eq.s32.totalorder %s2471_s18, 0 }
   0x9   : > { %p40_p3 = scmp.ne.s32.totalorder %s2463_s16, %s2459_s15  ;;  %p41_p4 = scmp.eq.s32.totalorder %s2527_s19, 0 }
   0xa   : > { %s2543_s24 = scalar_select %p25_p1, %s2467_s17, %s27_s22  }
   0xb   : > { %p2545_p5 = por %p35_p2, %p34_p0  ;;  %p2549_p6 = por %p41_p4, %p40_p3 }
   0xc   : > { %p127_p7 = scmp.eq.s32.totalorder %s2527_s19, 1  ;;  %p133_p8 = scmp.eq.s32.totalorder %s2170_s20, 1 }
   0xd   : > { %p2332_p10 = scmp.lt.s32.totalorder %s2471_s18, 2  ;;  %s162_s29 = sand.u32 1, %s2467_s17  }
   0xe   : > { %p2556_p11 = por %p127_p7, %p34_p0  ;;  %p2560_p12 = por %p133_p8, %p40_p3 }
   0xf   : > { %s2318_s30 = sshll.u32 %s2471_s18, 3  ;;  %s2173_s5 = sshll.u32 %s162_s29, 3 }
  0x10   : > { %s171_s8 = scalar_lea.hbm %s3047_s0, %s2318_s30  ;;  %s166_s10 = scalar_lea.vmem [#allocation2], %s2173_s5 }
  0x11   : > { %s173_s9 = sshll.u32 %s171_s8, 4  ;;  %s175_s11 = sshll.u32 %s166_s10, 4  ;;  %s174_s9 = int_to_ptr.hbm [resolvable:$true] %s173_s9  ;;  %s176_s11 = int_to_ptr.vmem [resolvable:$true] %s175_s11 }
  0x12   : > { %p2571_p13 = pnand %p2332_p10, %p2545_p5  ;;  %p2176_p0 = scmp.ge.s32.totalorder %s2471_s18, 1 }
  0x13   : > { %p180_p1 = scmp.lt.s32.totalorder %s2471_s18, 3  ;;  %s163_s13 = scalar_lea.sflag [#allocation3], %s162_s29 }
  0x14   : > { %s2375_s14 = sshra.s32 %s174_s9, 4  ;;  %p2379_p3 = pneg %p2571_p13  ;;  %s2376_s14 = int_to_ptr.hbm [resolvable:$true] %s2375_s14 }
  0x15   : > { %s2377_s20 = scalar_lea.hbm %s2376_s14, 8  ;;  %s2382_s25 = scalar_lea.hbm %s3047_s0, 16 }
  0x16   : > { %p2378_p2 = scmp.ne.s32.totalorder %s2376_s14, %s2377_s20  ;;  %p2383_p5 = scmp.lt.s32.totalorder %s2376_s14, %s3047_s0 }
  0x17   : > { %p2384_p8 = scmp.lt.s32.totalorder %s2382_s25, %s2377_s20 }
  0x18   : > { %p2380_p4 = pnand %p2379_p3, %p2378_p2 }
  0x19   : > { %p2385_p10 = por %p2384_p8, %p2383_p5 }
  0x1a   : > { %p2381_p7 = pneg %p2380_p4 }
  0x1c   : > { %p2386_p9 = pnand %p2385_p10, %p2381_p7 }
  0x1e   : > { %2389 = shalt.err (!%p2386_p9)
}
  0x1f   : > { %2327 = dma.hbm_to_vmem [thread:$0]  (!%p2571_p13), %s174_s9, 128, %s176_s11, %s163_s13  }
  0x20   : > { %p181_p2 = pnand %p2176_p0, %p180_p1 }
  0x21   : > { %s2592_s29 = sand.u32 (!%p181_p2), 1, %s2463_s16  }
  0x22   : > { %184 = sbr.rel (%p181_p2) target bundleno = 692 (0x2b4), region = 36  ;;  %s2177_s6 = sshll.u32 (!%p181_p2), %s2592_s29, 3 }
  0x23   : > { %s187_s7 = scalar_lea.sflag (!%p181_p2), [#allocation3], %s2592_s29  ;;  %s190_s8 = scalar_lea.vmem (!%p181_p2), [#allocation2], %s2177_s6 }
  0x27   : > { %2450 = dma.done.wait (%p2549_p6), %s187_s7, 128  }
  0x28   : > { %2452 = vsyncadd (%p2549_p6), %s187_s7, 4294967168  ;;  %v2473_v0 = vmov 0   ;;  %v220_v1 = vld [vmem:[%s3049_s2 + $0x8] sm:$0xff]  ;;  %vm242_vm0 = vcmask 1043456   ;;  %v217_v3 = vld [vmem:[%s3048_s1] sm:$0xff]  ;;  %vm235_vm1 = vcmask 31744  }
  0x29   : > { %2374 = vset.pattern.permute.xlu0 %v2473_v0  ;;  %v216_v2 = vld [vmem:[%s190_s8] sm:$0xff]  ;;  %v219_v4 = vld [vmem:[%s3049_s2] sm:$0xff]  ;;  %v2622_v9 = vld [vmem:[%s3050_s3 + $0x18] sm:$0xff]  ;;  %vm300_vm2 = vcmask 130048   ;;  %s2474_s9 = smov 80   ;;  %s2475_s10 = smov 96  }
  0x2a   : > { %228 = vperm.xlu0 %2374, %v220_v1   ;;  %232 = vst [vmem:[#allocation1] ss:$2 sm:$0xff] %v216_v2  ;;  %v218_v7 = vld [vmem:[%s3048_s1 + $0x8] sm:$0xff]  ;;  %v2627_v10 = vld [vmem:[%s3050_s3] sm:$0xff]  ;;  %317 = vmatpush.msra.mxu2 %v2622_v9  ;;  %v2636_v11 = vld [vmem:[%s3050_s3 + $0x10] sm:$0xff]  ;;  %s2476_s11 = smov 112  }
  0x2b   : > { %v2615_v8 = vld [vmem:[%s3050_s3 + $0x8] sm:$0xff]  ;;  %s2477_s12 = smov 64   ;;  %s2478_s13 = smov 48   ;;  %vm345_vm3 = vcmask 257024   ;;  %vm401_vm4 = vcmask 519424   ;;  %vm459_vm5 = vcmask 781824  }
  0x2c   : > { %339 = vmatpush.msra.mxu3 %v2615_v8  ;;  %318 = vmatpush.msra.mxu2 %v2636_v11  ;;  %s2479_s14 = smov 32   ;;  %s2480_s26 = smov 16   ;;  %vm517_vm6 = vcmask 1044224  }
  0x2d   : > { %s2178_s20 = sshll.u32 %s2592_s29, 5  ;;  %s2319_s23 = sshll.u32 %s2527_s19, 5 }
  0x2e   : > { %340 = vmatpush.msra.mxu3 %v2627_v10  ;;  %369 = vmatpush.msrb.mxu2 %v2622_v9  ;;  %s2772_s22 = scalar_lea.vmem [#allocation5], %s2178_s20  ;;  %s2095_s5 = scalar_lea.hbm %s3051_s4, %s2319_s23 }
  0x2f   : > { %s2097_s6 = sshll.u32 %s2772_s22, 4  ;;  %s2099_s7 = sshll.u32 %s2095_s5, 4  ;;  %s2098_s6 = int_to_ptr.vmem [resolvable:$true] %s2097_s6  ;;  %s2100_s7 = int_to_ptr.hbm [resolvable:$true] %s2099_s7 }
  0x30   : > { %391 = vmatpush.msrb.mxu3 %v2615_v8  ;;  %370 = vmatpush.msrb.mxu2 %v2636_v11  ;;  %s2084_s8 = scalar_lea.sflag [#allocation4], %s2592_s29  ;;  %s2419_s19 = sshra.s32 %s2100_s7, 4  ;;  %s2420_s19 = int_to_ptr.hbm [resolvable:$true] %s2419_s19 }
  0x31   : > { %v233_v5 = vld.sshfl [vmem:[#allocation1] sm:$0xff pattern:$0x75316420]  ;;  %v234_v6 = vld.sshfl [vmem:[#allocation1 + $0x8] sm:$0xff pattern:$0x75316420]  ;;  %p2426_p0 = scmp.lt.s32.totalorder %s2420_s19, %s3051_s4 }
  0x32   : > { %2179 = vmatpush.msk.msra.mxu0 %vm242_vm0, %v233_v5  ;;  %2182 = vmatpush.msk.msra.mxu1 %vm242_vm0, %v234_v6 }
  0x33   : > { %2180 = vmatmul.msk.f32.vlgmr.msra.gmra.mxu0 %vm235_vm1, %v217_v3  ;;  %2183 = vmatmul.msk.f32.vlgmr.msra.gmra.mxu1 %vm235_vm1, %v217_v3 }
  0x34   : > { %223 = vperm.xlu0 %2374, %v219_v4   ;;  %449 = vmatpush.msrb.mxu1 %v2615_v8 }
  0x35   : > { %425 = vmatpush.msrb.mxu0 %v2622_v9  ;;  %392 = vmatpush.msrb.mxu3 %v2627_v10 }
  0x36   : > { %450 = vmatpush.msrb.mxu1 %v2627_v10 }
  0x37   : > { %426 = vmatpush.msrb.mxu0 %v2636_v11 }
  0x38   : > { %565 = vmatpush.msra.mxu1 %v2615_v8 }
  0x39   : > { %541 = vmatpush.msra.mxu0 %v2622_v9 }
  0x3a   : > { %566 = vmatpush.msra.mxu1 %v2627_v10 }
  0x3b   : > { %2181 = vmatmul.msk.f32.gmra.mxu0 %vm235_vm1, %v218_v7  ;;  %2184 = vmatmul.msk.f32.gmra.mxu1 %vm235_vm1, %v218_v7 }
  0x3c   : > { %542 = vmatpush.msra.mxu0 %v2636_v11 }
  0x9c   : > { %v229_v12 = vpop.permute.xlu0 %228 }
  0xa6   : > { %v224_v13 = vpop.permute.xlu0 %223 }
  0xb0   : > { %v264_v14 = vpop.f32.mrf.mxu0  ;;  %v287_v20 = vpop.f32.mrf.mxu1 }
  0xb1   : > { %v265_v15 = vadd.f32 %v264_v14, %v224_v13  ;;  %v2684_v21 = vadd.f32 %v287_v20, %v224_v13 }
  0xb3   : > { %657 = vrot.lane.b32.xlu1 %v265_v15, %s2474_s9  ;;  %547 = vrot.lane.b32.xlu0 %v265_v15, %s2475_s10  ;;  %v299_v16 = vrot.slane %v265_v15, 4  ;;  %v2691_v22 = vrot.slane %v2684_v21, 4 }
  0xb4   : > { %431 = vrot.lane.b32.xlu2 %v265_v15, %s2476_s11  ;;  %2188 = vmatmul.msk.f32.vlgmr.msra.gmra.mxu3 %vm300_vm2, %v265_v15 }
  0xb5   : > { %2187 = vmatmul.msk.f32.vlgmr.msra.gmra.mxu2 %vm300_vm2, %v299_v16  ;;  %507 = vmatpush.msra.mxu3 %v2615_v8 }
  0xb6   : > { %483 = vmatpush.msra.mxu2 %v2622_v9 }
  0xb7   : > { %508 = vmatpush.msra.mxu3 %v2627_v10 }
  0xb8   : > { %v267_v17 = vpop.f32.mrf.mxu0  ;;  %484 = vmatpush.msra.mxu2 %v2636_v11  ;;  %v290_v23 = vpop.f32.mrf.mxu1 }
  0xb9   : > { %v268_v18 = vadd.f32 %v267_v17, %v229_v12  ;;  %v2697_v24 = vadd.f32 %v290_v23, %v229_v12 }
  0xbb   : > { %747 = vrot.lane.b32.xlu1 %v299_v16, %s2477_s12  ;;  %633 = vrot.lane.b32.xlu0 %v299_v16, %s2474_s9  ;;  %v352_v19 = vrot.slane %v268_v18, 4  ;;  %v2700_v25 = vrot.slane %v2697_v24, 4 }
  0xbc   : > { %771 = vrot.lane.b32.xlu2 %v265_v15, %s2477_s12  ;;  %2192 = vmatmul.msk.f32.vlgmr.msrb.gmra.mxu3 %vm300_vm2, %v268_v18 }
  0xbd   : > { %2191 = vmatmul.msk.f32.vlgmr.msrb.gmra.mxu2 %vm300_vm2, %v352_v19  ;;  %618 = vmatpush.msrb.mxu3 %v2615_v8 }
  0xbe   : > { %594 = vmatpush.msrb.mxu2 %v2622_v9 }
  0xbf   : > { %619 = vmatpush.msrb.mxu3 %v2627_v10 }
  0xc0   : > { %595 = vmatpush.msrb.mxu2 %v2636_v11 }
  0xc3   : > { %489 = vrot.lane.b32.xlu1 %v268_v18, %s2476_s11  ;;  %824 = vrot.lane.b32.xlu0 %v268_v18, %s2477_s12 }
  0xc4   : > { %407 = vrot.lane.b32.xlu2 %v299_v16, %s2476_s11 }
  0xcb   : > { %600 = vrot.lane.b32.xlu1 %v268_v18, %s2475_s10  ;;  %576 = vrot.lane.b32.xlu0 %v352_v19, %s2475_s10 }
  0xcc   : > { %523 = vrot.lane.b32.xlu2 %v299_v16, %s2475_s10 }
  0xd3   : > { %465 = vrot.lane.b32.xlu1 %v352_v19, %s2476_s11  ;;  %881 = vrot.lane.b32.xlu0 %v265_v15, %s2478_s13 }
  0xd4   : > { %714 = vrot.lane.b32.xlu2 %v268_v18, %s2474_s9 }
  0xdb   : > { %938 = vrot.lane.b32.xlu1 %v268_v18, %s2478_s13  ;;  %971 = vrot.lane.b32.xlu0 %v299_v16, %s2479_s14 }
  0xdc   : > { %857 = vrot.lane.b32.xlu2 %v299_v16, %s2478_s13 }
  0xe3   : > { %690 = vrot.lane.b32.xlu1 %v352_v19, %s2474_s9  ;;  %914 = vrot.lane.b32.xlu0 %v352_v19, %s2478_s13 }
  0xe4   : > { %800 = vrot.lane.b32.xlu2 %v352_v19, %s2477_s12 }
  0xeb   : > { %995 = vrot.lane.b32.xlu1 %v265_v15, %s2479_s14  ;;  %1162 = vrot.lane.b32.xlu0 %v268_v18, %s2480_s26 }
  0xec   : > { %1048 = vrot.lane.b32.xlu2 %v268_v18, %s2479_s14 }
  0xf3   : > { %1081 = vrot.lane.b32.xlu1 %v299_v16, %s2480_s26  ;;  %1325 = vrot.lane.b32.xlu0 %v2684_v21, %s2476_s11 }
  0xf4   : > { %1105 = vrot.lane.b32.xlu2 %v265_v15, %s2480_s26 }
  0xfb   : > { %1024 = vrot.lane.b32.xlu1 %v352_v19, %s2479_s14  ;;  %1415 = vrot.lane.b32.xlu0 %v2691_v22, %s2475_s10 }
  0xfc   : > { %1138 = vrot.lane.b32.xlu2 %v352_v19, %s2480_s26 }
 0x103   : > { %1382 = vrot.lane.b32.xlu1 %v2697_v24, %s2476_s11  ;;  %1358 = vrot.lane.b32.xlu0 %v2700_v25, %s2476_s11 }
 0x104   : > { %1301 = vrot.lane.b32.xlu2 %v2691_v22, %s2476_s11 }
 0x10b   : > { %1439 = vrot.lane.b32.xlu1 %v2684_v21, %s2475_s10  ;;  %1606 = vrot.lane.b32.xlu0 %v2697_v24, %s2474_s9 }
 0x10c   : > { %1492 = vrot.lane.b32.xlu2 %v2697_v24, %s2475_s10 }
 0x10e   : > { %v432_v26 = vpop.permute.xlu2 %431 }
 0x10f   : > { %2196 = vmatmul.msk.f32.vlgmr.msrb.gmra.mxu1 %vm300_vm2, %v432_v26 }
 0x110   : > { %675 = vmatpush.msrb.mxu1 %v2615_v8 }
 0x112   : > { %676 = vmatpush.msrb.mxu1 %v2627_v10 }
 0x113   : > { %1525 = vrot.lane.b32.xlu1 %v2691_v22, %s2474_s9  ;;  %1663 = vrot.lane.b32.xlu0 %v2684_v21, %s2477_s12 }
 0x114   : > { %1549 = vrot.lane.b32.xlu2 %v2684_v21, %s2474_s9 }
 0x116   : > { %v772_v27 = vpop.permute.xlu2 %771 }
 0x11b   : > { %1468 = vrot.lane.b32.xlu1 %v2700_v25, %s2475_s10  ;;  %1692 = vrot.lane.b32.xlu0 %v2700_v25, %s2477_s12 }
 0x11c   : > { %1582 = vrot.lane.b32.xlu2 %v2700_v25, %s2474_s9  ;;  %s2421_s9 = scalar_lea.hbm %s2420_s19, 32 }
 0x11d   : > { %p2422_p6 = scmp.ne.s32.totalorder %s2420_s19, %s2421_s9 }
 0x11e   : > { %v408_v28 = vpop.permute.xlu2 %407 }
 0x11f   : > { %2195 = vmatmul.msk.f32.vlgmr.msrb.gmra.mxu0 %vm300_vm2, %v408_v28  ;;  %p2423_p9 = pnand %p2422_p6, %p2556_p11 }
 0x120   : > { %651 = vmatpush.msrb.mxu0 %v2622_v9 }
 0x121   : > { %p2424_p13 = pneg %p2423_p9 }
 0x122   : > { %652 = vmatpush.msrb.mxu0 %v2636_v11 }
 0x123   : > { %1716 = vrot.lane.b32.xlu1 %v2697_v24, %s2477_s12  ;;  %1749 = vrot.lane.b32.xlu0 %v2691_v22, %s2478_s13 }
 0x124   : > { %1639 = vrot.lane.b32.xlu2 %v2691_v22, %s2477_s12 }
 0x125   : > { %v658_v29 = vpop.permute.xlu1 %657  ;;  %v548_v30 = vpop.permute.xlu0 %547 }
 0x126   : > { %v524_v31 = vpop.permute.xlu2 %523  ;;  %2204 = vmatmul.msk.f32.vlgmr.msra.gmra.mxu1 %vm300_vm2, %v548_v30 }
 0x127   : > { %2203 = vmatmul.msk.f32.vlgmr.msra.gmra.mxu0 %vm300_vm2, %v524_v31  ;;  %789 = vmatpush.msra.mxu1 %v2615_v8 }
 0x128   : > { %765 = vmatpush.msra.mxu0 %v2622_v9 }
 0x129   : > { %790 = vmatpush.msra.mxu1 %v2627_v10 }
 0x12a   : > { %766 = vmatpush.msra.mxu0 %v2636_v11 }
 0x12b   : > { %1773 = vrot.lane.b32.xlu1 %v2684_v21, %s2478_s13  ;;  %1940 = vrot.lane.b32.xlu0 %v2697_v24, %s2479_s14 }
 0x12c   : > { %1830 = vrot.lane.b32.xlu2 %v2697_v24, %s2478_s13 }
 0x12d   : > { %v748_v32 = vpop.permute.xlu1 %747  ;;  %v634_v33 = vpop.permute.xlu0 %633 }
 0x12e   : > { %v715_v34 = vpop.permute.xlu2 %714  ;;  %2212 = vmatmul.msk.f32.vlgmr.msrb.gmra.mxu1 %vm300_vm2, %v658_v29 }
 0x12f   : > { %2211 = vmatmul.msk.f32.vlgmr.msrb.gmra.mxu0 %vm300_vm2, %v634_v33  ;;  %899 = vmatpush.msrb.mxu1 %v2615_v8 }
 0x130   : > { %875 = vmatpush.msrb.mxu0 %v2622_v9 }
 0x131   : > { %900 = vmatpush.msrb.mxu1 %v2627_v10 }
 0x132   : > { %876 = vmatpush.msrb.mxu0 %v2636_v11 }
 0x133   : > { %1806 = vrot.lane.b32.xlu1 %v2700_v25, %s2478_s13  ;;  %2030 = vrot.lane.b32.xlu0 %v2700_v25, %s2480_s26 }
 0x134   : > { %1916 = vrot.lane.b32.xlu2 %v2700_v25, %s2479_s14 }
 0x135   : > { %v490_v35 = vpop.permute.xlu1 %489  ;;  %v825_v36 = vpop.permute.xlu0 %824 }
 0x136   : > { %v858_v37 = vpop.permute.xlu2 %857  ;;  %2200 = vmatmul.msk.f32.vlgmr.msra.gmra.mxu3 %vm300_vm2, %v490_v35  ;;  %2220 = vmatmul.msk.f32.vlgmr.msra.gmra.mxu1 %vm300_vm2, %v772_v27 }
 0x137   : > { %2219 = vmatmul.msk.f32.vlgmr.msra.gmra.mxu0 %vm300_vm2, %v748_v32  ;;  %732 = vmatpush.msra.mxu3 %v2615_v8  ;;  %v342_v38 = vpop.f32.mrf.mxu3 }
 0x138   : > { %v320_v39 = vpop.f32.mrf.mxu2  ;;  %989 = vmatpush.msra.mxu0 %v2622_v9  ;;  %1013 = vmatpush.msra.mxu1 %v2615_v8 }
 0x139   : > { %v343_v40 = vadd.f32 %v342_v38, %v320_v39  ;;  %733 = vmatpush.msra.mxu3 %v2627_v10 }
 0x13a   : > { %990 = vmatpush.msra.mxu0 %v2636_v11  ;;  %1014 = vmatpush.msra.mxu1 %v2627_v10 }
 0x13b   : > { %346 = vst.msk [vmem:[%s2772_s22] sm:$0xf] %vm345_vm3, %v343_v40  ;;  %1863 = vrot.lane.b32.xlu1 %v2691_v22, %s2479_s14  ;;  %1997 = vrot.lane.b32.xlu0 %v2684_v21, %s2480_s26 }
 0x13c   : > { %1887 = vrot.lane.b32.xlu2 %v2684_v21, %s2479_s14 }
 0x13d   : > { %v601_v41 = vpop.permute.xlu1 %600  ;;  %v577_v42 = vpop.permute.xlu0 %576 }
 0x13e   : > { %v801_v43 = vpop.permute.xlu2 %800  ;;  %2208 = vmatmul.msk.f32.vlgmr.msrb.gmra.mxu3 %vm300_vm2, %v601_v41 }
 0x13f   : > { %2227 = vmatmul.msk.f32.vlgmr.msrb.gmra.mxu0 %vm300_vm2, %v858_v37  ;;  %842 = vmatpush.msrb.mxu3 %v2615_v8  ;;  %v394_v48 = vpop.f32.mrf.mxu3 }
 0x140   : > { %1099 = vmatpush.msrb.mxu0 %v2622_v9  ;;  %v372_v46 = vpop.f32.mrf.mxu2 }
 0x141   : > { %843 = vmatpush.msrb.mxu3 %v2627_v10  ;;  %v395_v49 = vadd.f32 %v394_v48, %v372_v46 }
 0x142   : > { %1100 = vmatpush.msrb.mxu0 %v2636_v11 }
 0x143   : > { %2054 = vrot.lane.b32.xlu1 %v2697_v24, %s2480_s26 }
 0x144   : > { %1973 = vrot.lane.b32.xlu2 %v2691_v22, %s2480_s26 }
 0x145   : > { %v466_v44 = vpop.permute.xlu1 %465  ;;  %v882_v45 = vpop.permute.xlu0 %881 }
 0x146   : > { %v1049_v47 = vpop.permute.xlu2 %1048  ;;  %2199 = vmatmul.msk.f32.vlgmr.msra.gmra.mxu2 %vm300_vm2, %v466_v44  ;;  %2216 = vmatmul.msk.f32.vlgmr.msra.gmra.mxu3 %vm300_vm2, %v715_v34 }
 0x147   : > { %2228 = vmatmul.msk.f32.vlgmr.msrb.gmra.mxu1 %vm300_vm2, %v882_v45  ;;  %708 = vmatpush.msra.mxu2 %v2622_v9 }
 0x148   : > { %956 = vmatpush.msra.mxu3 %v2615_v8  ;;  %1123 = vmatpush.msrb.mxu1 %v2615_v8 }
 0x149   : > { %709 = vmatpush.msra.mxu2 %v2636_v11 }
 0x14a   : > { %957 = vmatpush.msra.mxu3 %v2627_v10  ;;  %1124 = vmatpush.msrb.mxu1 %v2627_v10 }
 0x14b   : > { %398 = vrot.lane.b32.xlu1 %v395_v49, %s2479_s14 }
 0x14d   : > { %v939_v50 = vpop.permute.xlu1 %938  ;;  %v972_v51 = vpop.permute.xlu0 %971 }
 0x14e   : > { %v1106_v52 = vpop.permute.xlu2 %1105  ;;  %2207 = vmatmul.msk.f32.vlgmr.msrb.gmra.mxu2 %vm300_vm2, %v577_v42  ;;  %2224 = vmatmul.msk.f32.vlgmr.msrb.gmra.mxu3 %vm300_vm2, %v825_v36 }
 0x14f   : > { %2235 = vmatmul.msk.f32.vlgmr.msra.gmra.mxu0 %vm300_vm2, %v972_v51  ;;  %818 = vmatpush.msrb.mxu2 %v2622_v9 }
 0x150   : > { %1066 = vmatpush.msrb.mxu3 %v2615_v8  ;;  %1213 = vmatpush.msra.mxu0 %v2622_v9 }
 0x151   : > { %819 = vmatpush.msrb.mxu2 %v2636_v11 }
 0x152   : > { %1067 = vmatpush.msrb.mxu3 %v2627_v10  ;;  %1214 = vmatpush.msra.mxu0 %v2636_v11 }
 0x155   : > { %v691_v53 = vpop.permute.xlu1 %690  ;;  %v915_v54 = vpop.permute.xlu0 %914 }
 0x156   : > { %v1139_v55 = vpop.permute.xlu2 %1138  ;;  %2215 = vmatmul.msk.f32.vlgmr.msra.gmra.mxu2 %vm300_vm2, %v691_v53  ;;  %2232 = vmatmul.msk.f32.vlgmr.msra.gmra.mxu3 %vm300_vm2, %v939_v50 }
 0x157   : > { %932 = vmatpush.msra.mxu2 %v2622_v9  ;;  %1180 = vmatpush.msra.mxu3 %v2615_v8 }
 0x159   : > { %933 = vmatpush.msra.mxu2 %v2636_v11  ;;  %1181 = vmatpush.msra.mxu3 %v2627_v10 }
 0x15d   : > { %v996_v56 = vpop.permute.xlu1 %995  ;;  %v1163_v57 = vpop.permute.xlu0 %1162 }
 0x15e   : > { %v1302_v58 = vpop.permute.xlu2 %1301  ;;  %2223 = vmatmul.msk.f32.vlgmr.msrb.gmra.mxu2 %vm300_vm2, %v801_v43  ;;  %2236 = vmatmul.msk.f32.vlgmr.msra.gmra.mxu1 %vm300_vm2, %v996_v56 }
 0x15f   : > { %2240 = vmatmul.msk.f32.vlgmr.msrb.gmra.mxu3 %vm300_vm2, %v1049_v47  ;;  %1042 = vmatpush.msrb.mxu2 %v2622_v9 }
 0x160   : > { %1235 = vmatpush.msra.mxu1 %v2615_v8  ;;  %1286 = vmatpush.msrb.mxu3 %v2615_v8 }
 0x161   : > { %1043 = vmatpush.msrb.mxu2 %v2636_v11 }
 0x162   : > { %1236 = vmatpush.msra.mxu1 %v2627_v10  ;;  %1287 = vmatpush.msrb.mxu3 %v2627_v10 }
 0x165   : > { %v1082_v59 = vpop.permute.xlu1 %1081  ;;  %v1326_v60 = vpop.permute.xlu0 %1325 }
 0x166   : > { %2231 = vmatmul.msk.f32.vlgmr.msra.gmra.mxu2 %vm300_vm2, %v915_v54  ;;  %2243 = vmatmul.msk.f32.vlgmr.msrb.gmra.mxu0 %vm300_vm2, %v1082_v59  ;;  %v1493_v61 = vpop.permute.xlu2 %1492 }
 0x167   : > { %2244 = vmatmul.msk.f32.vlgmr.msrb.gmra.mxu1 %vm300_vm2, %v1106_v52  ;;  %2248 = vmatmul.msk.f32.vlgmr.msra.gmra.mxu3 %vm300_vm2, %v1163_v57 }
 0x168   : > { %1156 = vmatpush.msra.mxu2 %v2622_v9  ;;  %1319 = vmatpush.msrb.mxu0 %v2622_v9 }
 0x169   : > { %1343 = vmatpush.msrb.mxu1 %v2615_v8  ;;  %1400 = vmatpush.msra.mxu3 %v2615_v8 }
 0x16a   : > { %1157 = vmatpush.msra.mxu2 %v2636_v11  ;;  %1320 = vmatpush.msrb.mxu0 %v2636_v11 }
 0x16b   : > { %1344 = vmatpush.msrb.mxu1 %v2627_v10  ;;  %1401 = vmatpush.msra.mxu3 %v2627_v10 }
 0x16d   : > { %v1025_v62 = vpop.permute.xlu1 %1024  ;;  %v1416_v63 = vpop.permute.xlu0 %1415 }
 0x16e   : > { %2239 = vmatmul.msk.f32.vlgmr.msrb.gmra.mxu2 %vm300_vm2, %v1025_v62  ;;  %2251 = vmatmul.msk.f32.vlgmr.msra.gmra.mxu0 %vm300_vm2, %v2691_v22  ;;  %v1550_v0 = vpop.permute.xlu2 %1549 }
 0x16f   : > { %2252 = vmatmul.msk.f32.vlgmr.msra.gmra.mxu1 %vm300_vm2, %v2684_v21  ;;  %2256 = vmatmul.msk.f32.vlgmr.msrb.gmra.mxu3 %vm300_vm2, %v2697_v24 }
 0x170   : > { %1264 = vmatpush.msrb.mxu2 %v2622_v9  ;;  %1433 = vmatpush.msra.mxu0 %v2622_v9 }
 0x171   : > { %1457 = vmatpush.msra.mxu1 %v2615_v8  ;;  %1510 = vmatpush.msrb.mxu3 %v2615_v8 }
 0x172   : > { %1265 = vmatpush.msrb.mxu2 %v2636_v11  ;;  %1434 = vmatpush.msra.mxu0 %v2636_v11 }
 0x173   : > { %1458 = vmatpush.msra.mxu1 %v2627_v10  ;;  %1511 = vmatpush.msrb.mxu3 %v2627_v10 }
 0x175   : > { %v1383_v1 = vpop.permute.xlu1 %1382  ;;  %v1359_v2 = vpop.permute.xlu0 %1358 }
 0x176   : > { %2247 = vmatmul.msk.f32.vlgmr.msra.gmra.mxu2 %vm300_vm2, %v1139_v55  ;;  %2259 = vmatmul.msk.f32.vlgmr.msrb.gmra.mxu0 %vm300_vm2, %v1302_v58  ;;  %v1583_v3 = vpop.permute.xlu2 %1582 }
 0x177   : > { %2260 = vmatmul.msk.f32.vlgmr.msrb.gmra.mxu1 %vm300_vm2, %v1326_v60  ;;  %2264 = vmatmul.msk.f32.vlgmr.msra.gmra.mxu3 %vm300_vm2, %v1383_v1 }
 0x178   : > { %1376 = vmatpush.msra.mxu2 %v2622_v9  ;;  %1543 = vmatpush.msrb.mxu0 %v2622_v9 }
 0x179   : > { %1567 = vmatpush.msrb.mxu1 %v2615_v8  ;;  %1624 = vmatpush.msra.mxu3 %v2615_v8 }
 0x17a   : > { %1377 = vmatpush.msra.mxu2 %v2636_v11  ;;  %1544 = vmatpush.msrb.mxu0 %v2636_v11 }
 0x17b   : > { %1568 = vmatpush.msrb.mxu1 %v2627_v10  ;;  %1625 = vmatpush.msra.mxu3 %v2627_v10 }
 0x17d   : > { %v1440_v4 = vpop.permute.xlu1 %1439  ;;  %v1607_v5 = vpop.permute.xlu0 %1606 }
 0x17e   : > { %2255 = vmatmul.msk.f32.vlgmr.msrb.gmra.mxu2 %vm300_vm2, %v2700_v25  ;;  %2267 = vmatmul.msk.f32.vlgmr.msra.gmra.mxu0 %vm300_vm2, %v1416_v63  ;;  %v1640_v12 = vpop.permute.xlu2 %1639 }
 0x17f   : > { %2268 = vmatmul.msk.f32.vlgmr.msra.gmra.mxu1 %vm300_vm2, %v1440_v4  ;;  %2272 = vmatmul.msk.f32.vlgmr.msrb.gmra.mxu3 %vm300_vm2, %v1493_v61 }
 0x180   : > { %1486 = vmatpush.msrb.mxu2 %v2622_v9  ;;  %1657 = vmatpush.msra.mxu0 %v2622_v9 }
 0x181   : > { %1681 = vmatpush.msra.mxu1 %v2615_v8  ;;  %1734 = vmatpush.msrb.mxu3 %v2615_v8 }
 0x182   : > { %1487 = vmatpush.msrb.mxu2 %v2636_v11  ;;  %1658 = vmatpush.msra.mxu0 %v2636_v11 }
 0x183   : > { %1682 = vmatpush.msra.mxu1 %v2627_v10  ;;  %1735 = vmatpush.msrb.mxu3 %v2627_v10 }
 0x185   : > { %v1526_v6 = vpop.permute.xlu1 %1525  ;;  %v1664_v7 = vpop.permute.xlu0 %1663 }
 0x186   : > { %2263 = vmatmul.msk.f32.vlgmr.msra.gmra.mxu2 %vm300_vm2, %v1359_v2  ;;  %2275 = vmatmul.msk.f32.vlgmr.msrb.gmra.mxu0 %vm300_vm2, %v1526_v6  ;;  %v1831_v15 = vpop.permute.xlu2 %1830 }
 0x187   : > { %2276 = vmatmul.msk.f32.vlgmr.msrb.gmra.mxu1 %vm300_vm2, %v1550_v0  ;;  %2280 = vmatmul.msk.f32.vlgmr.msra.gmra.mxu3 %vm300_vm2, %v1607_v5 }
 0x188   : > { %1600 = vmatpush.msra.mxu2 %v2622_v9  ;;  %1767 = vmatpush.msrb.mxu0 %v2622_v9 }
 0x189   : > { %1791 = vmatpush.msrb.mxu1 %v2615_v8  ;;  %1848 = vmatpush.msra.mxu3 %v2615_v8 }
 0x18a   : > { %1601 = vmatpush.msra.mxu2 %v2636_v11  ;;  %1768 = vmatpush.msrb.mxu0 %v2636_v11 }
 0x18b   : > { %1792 = vmatpush.msrb.mxu1 %v2627_v10  ;;  %1849 = vmatpush.msra.mxu3 %v2627_v10 }
 0x18c   : > { %v452_v19 = vpop.f32.mrf.mxu1 }
 0x18d   : > { %v1469_v13 = vpop.permute.xlu1 %1468  ;;  %v1693_v14 = vpop.permute.xlu0 %1692 }
 0x18e   : > { %2271 = vmatmul.msk.f32.vlgmr.msrb.gmra.mxu2 %vm300_vm2, %v1469_v13  ;;  %2283 = vmatmul.msk.f32.vlgmr.msra.gmra.mxu0 %vm300_vm2, %v1640_v12  ;;  %v1917_v18 = vpop.permute.xlu2 %1916 }
 0x18f   : > { %2284 = vmatmul.msk.f32.vlgmr.msra.gmra.mxu1 %vm300_vm2, %v1664_v7  ;;  %1710 = vmatpush.msrb.mxu2 %v2622_v9 }
 0x190   : > { %1905 = vmatpush.msra.mxu1 %v2615_v8  ;;  %1881 = vmatpush.msra.mxu0 %v2622_v9 }
 0x191   : > { %1711 = vmatpush.msrb.mxu2 %v2636_v11 }
 0x192   : > { %1906 = vmatpush.msra.mxu1 %v2627_v10  ;;  %1882 = vmatpush.msra.mxu0 %v2636_v11 }
 0x195   : > { %v1717_v16 = vpop.permute.xlu1 %1716  ;;  %v1750_v17 = vpop.permute.xlu0 %1749 }
 0x196   : > { %2279 = vmatmul.msk.f32.vlgmr.msra.gmra.mxu2 %vm300_vm2, %v1583_v3  ;;  %2288 = vmatmul.msk.f32.vlgmr.msrb.gmra.mxu3 %vm300_vm2, %v1717_v16  ;;  %v1888_v25 = vpop.permute.xlu2 %1887 }
 0x197   : > { %2291 = vmatmul.msk.f32.vlgmr.msrb.gmra.mxu0 %vm300_vm2, %v1750_v17  ;;  %1824 = vmatpush.msra.mxu2 %v2622_v9 }
 0x198   : > { %1958 = vmatpush.msrb.mxu3 %v2615_v8  ;;  %1991 = vmatpush.msrb.mxu0 %v2622_v9 }
 0x199   : > { %1825 = vmatpush.msra.mxu2 %v2636_v11 }
 0x19a   : > { %1959 = vmatpush.msrb.mxu3 %v2627_v10  ;;  %1992 = vmatpush.msrb.mxu0 %v2636_v11 }
 0x19c   : > { %v428_v20 = vpop.f32.mrf.mxu0 }
 0x19d   : > { %v453_v21 = vadd.f32 %v452_v19, %v428_v20  ;;  %v1774_v22 = vpop.permute.xlu1 %1773  ;;  %v1941_v23 = vpop.permute.xlu0 %1940 }
 0x19e   : > { %2287 = vmatmul.msk.f32.vlgmr.msrb.gmra.mxu2 %vm300_vm2, %v1693_v14  ;;  %2292 = vmatmul.msk.f32.vlgmr.msrb.gmra.mxu1 %vm300_vm2, %v1774_v22 }
 0x19f   : > { %456 = vrot.lane.b32.xlu2 %v453_v21, %s2477_s12  ;;  %2296 = vmatmul.msk.f32.vlgmr.msra.gmra.mxu3 %vm300_vm2, %v1831_v15 }
 0x1a0   : > { %1934 = vmatpush.msrb.mxu2 %v2622_v9  ;;  %2015 = vmatpush.msrb.mxu1 %v2615_v8 }
 0x1a1   : > { %2072 = vmatpush.msra.mxu3 %v2615_v8 }
 0x1a2   : > { %1935 = vmatpush.msrb.mxu2 %v2636_v11  ;;  %2016 = vmatpush.msrb.mxu1 %v2627_v10 }
 0x1a3   : > { %v568_v24 = vpop.f32.mrf.mxu1  ;;  %2073 = vmatpush.msra.mxu3 %v2627_v10 }
 0x1a4   : > { %v544_v26 = vpop.f32.mrf.mxu0 }
 0x1a5   : > { %v569_v27 = vadd.f32 %v568_v24, %v544_v26  ;;  %v1807_v28 = vpop.permute.xlu1 %1806  ;;  %v2031_v29 = vpop.permute.xlu0 %2030 }
 0x1a6   : > { %2295 = vmatmul.msk.f32.vlgmr.msra.gmra.mxu2 %vm300_vm2, %v1807_v28  ;;  %2300 = vmatmul.msk.f32.vlgmr.msra.gmra.mxu1 %vm300_vm2, %v1888_v25 }
 0x1a7   : > { %571 = vst.msk [vmem:[%s2772_s22 + $0x4] sm:$0xf] %vm345_vm3, %v569_v27  ;;  %2304 = vmatmul.msk.f32.vlgmr.msrb.gmra.mxu3 %vm300_vm2, %v1941_v23  ;;  %2048 = vmatpush.msra.mxu2 %v2622_v9  ;;  %v1974_v9 = vpop.permute.xlu2 %1973 }
 0x1a9   : > { %2049 = vmatpush.msra.mxu2 %v2636_v11 }
 0x1ab   : > { %v678_v8 = vpop.f32.mrf.mxu1 }
 0x1ac   : > { %v654_v10 = vpop.f32.mrf.mxu0 }
 0x1ad   : > { %v679_v30 = vadd.f32 %v678_v8, %v654_v10  ;;  %v1864_v31 = vpop.permute.xlu1 %1863  ;;  %v1998_v32 = vpop.permute.xlu0 %1997 }
 0x1ae   : > { %2299 = vmatmul.msk.f32.vlgmr.msra.gmra.mxu0 %vm300_vm2, %v1864_v31  ;;  %2303 = vmatmul.msk.f32.vlgmr.msrb.gmra.mxu2 %vm300_vm2, %v1917_v18 }
 0x1af   : > { %682 = vrot.lane.b32.xlu2 %v679_v30, %s2477_s12  ;;  %2308 = vmatmul.msk.f32.vlgmr.msrb.gmra.mxu1 %vm300_vm2, %v1998_v32 }
 0x1b3   : > { %v792_v33 = vpop.f32.mrf.mxu1 }
 0x1b4   : > { %v768_v34 = vpop.f32.mrf.mxu0 }
 0x1b5   : > { %v793_v35 = vadd.f32 %v792_v33, %v768_v34  ;;  %v2055_v11 = vpop.permute.xlu1 %2054 }
 0x1b6   : > { %2307 = vmatmul.msk.f32.vlgmr.msrb.gmra.mxu0 %vm300_vm2, %v1974_v9  ;;  %2311 = vmatmul.msk.f32.vlgmr.msra.gmra.mxu2 %vm300_vm2, %v2031_v29 }
 0x1b7   : > { %795 = vst.msk [vmem:[%s2772_s22 + $0x8] sm:$0xf] %vm345_vm3, %v793_v35  ;;  %2312 = vmatmul.msk.f32.vlgmr.msra.gmra.mxu3 %vm300_vm2, %v2055_v11 }
 0x1b9   : > { %v510_v36 = vpop.f32.mrf.mxu3 }
 0x1bc   : > { %v878_v39 = vpop.f32.mrf.mxu0 }
 0x1bd   : > { %v399_v37 = vpop.permute.xlu1 %398 }
 0x1be   : > { %402 = vst.msk [vmem:[%s2772_s22] sm:$0xf] %vm401_vm4, %v399_v37 }
 0x1c1   : > { %v621_v38 = vpop.f32.mrf.mxu3 }
 0x1c4   : > { %v902_v40 = vpop.f32.mrf.mxu1 }
 0x1c5   : > { %v903_v41 = vadd.f32 %v902_v40, %v878_v39 }
 0x1c7   : > { %906 = vrot.lane.b32.xlu2 %v903_v41, %s2477_s12 }
 0x1c9   : > { %v486_v42 = vpop.f32.mrf.mxu2  ;;  %v735_v43 = vpop.f32.mrf.mxu3 }
 0x1ca   : > { %v511_v44 = vadd.f32 %v510_v36, %v486_v42 }
 0x1cc   : > { %514 = vrot.lane.b32.xlu0 %v511_v44, %s2475_s10  ;;  %v992_v51 = vpop.f32.mrf.mxu0 }
 0x1d1   : > { %v597_v45 = vpop.f32.mrf.mxu2  ;;  %v845_v46 = vpop.f32.mrf.mxu3 }
 0x1d2   : > { %v622_v47 = vadd.f32 %v621_v38, %v597_v45 }
 0x1d4   : > { %625 = vrot.lane.b32.xlu1 %v622_v47, %s2479_s14 }
 0x1d9   : > { %v711_v48 = vpop.f32.mrf.mxu2  ;;  %v959_v49 = vpop.f32.mrf.mxu3 }
 0x1da   : > { %v736_v50 = vadd.f32 %v735_v43, %v711_v48 }
 0x1db   : > { %v1016_v52 = vpop.f32.mrf.mxu1 }
 0x1dc   : > { %v1017_v53 = vadd.f32 %v1016_v52, %v992_v51  ;;  %739 = vrot.lane.b32.xlu0 %v736_v50, %s2475_s10 }
 0x1de   : > { %1019 = vst.msk [vmem:[%s2772_s22 + $0xc] sm:$0xf] %vm345_vm3, %v1017_v53 }
 0x1e1   : > { %v821_v54 = vpop.f32.mrf.mxu2 }
 0x1e2   : > { %v846_v55 = vadd.f32 %v845_v46, %v821_v54  ;;  %v1069_v56 = vpop.f32.mrf.mxu3 }
 0x1e3   : > { %v1102_v57 = vpop.f32.mrf.mxu0 }
 0x1e4   : > { %v1126_v58 = vpop.f32.mrf.mxu1  ;;  %849 = vrot.lane.b32.xlu1 %v846_v55, %s2479_s14 }
 0x1e5   : > { %v1127_v2 = vadd.f32 %v1126_v58, %v1102_v57 }
 0x1e9   : > { %v935_v59 = vpop.f32.mrf.mxu2 }
 0x1ea   : > { %v960_v60 = vadd.f32 %v959_v49, %v935_v59  ;;  %v1183_v63 = vpop.f32.mrf.mxu3 }
 0x1eb   : > { %v1216_v61 = vpop.f32.mrf.mxu0 }
 0x1ec   : > { %v1238_v62 = vpop.f32.mrf.mxu1  ;;  %963 = vrot.lane.b32.xlu0 %v960_v60, %s2475_s10 }
 0x1ed   : > { %v1239_v0 = vadd.f32 %v1238_v62, %v1216_v61 }
 0x1ef   : > { %1241 = vst.msk [vmem:[%s2772_s22 + $0x10] sm:$0xf] %vm345_vm3, %v1239_v0 }
 0x1f1   : > { %v1045_v1 = vpop.f32.mrf.mxu2 }
 0x1f2   : > { %v1070_v3 = vadd.f32 %v1069_v56, %v1045_v1  ;;  %v1289_v6 = vpop.f32.mrf.mxu3 }
 0x1f3   : > { %v1322_v4 = vpop.f32.mrf.mxu0 }
 0x1f4   : > { %v1346_v5 = vpop.f32.mrf.mxu1  ;;  %1130 = vrot.lane.b32.xlu0 %v1127_v2, %s2477_s12  ;;  %1073 = vrot.lane.b32.xlu1 %v1070_v3, %s2479_s14 }
 0x1f5   : > { %v1347_v13 = vadd.f32 %v1346_v5, %v1322_v4 }
 0x1f9   : > { %v457_v7 = vpop.permute.xlu2 %456  ;;  %v1159_v12 = vpop.f32.mrf.mxu2 }
 0x1fa   : > { %460 = vst.msk [vmem:[%s2772_s22] sm:$0xf] %vm459_vm5, %v457_v7  ;;  %v1184_v14 = vadd.f32 %v1183_v63, %v1159_v12  ;;  %v1403_v18 = vpop.f32.mrf.mxu3 }
 0x1fb   : > { %v1436_v15 = vpop.f32.mrf.mxu0 }
 0x1fc   : > { %v1460_v16 = vpop.f32.mrf.mxu1  ;;  %1187 = vrot.lane.b32.xlu2 %v1184_v14, %s2475_s10  ;;  %1350 = vrot.lane.b32.xlu1 %v1347_v13, %s2477_s12 }
 0x1fd   : > { %v1461_v17 = vadd.f32 %v1460_v16, %v1436_v15 }
 0x1ff   : > { %1463 = vst.msk [vmem:[%s2772_s22 + $0x14] sm:$0xf] %vm345_vm3, %v1461_v17 }
 0x201   : > { %v1267_v19 = vpop.f32.mrf.mxu2 }
 0x202   : > { %v1290_v20 = vadd.f32 %v1289_v6, %v1267_v19  ;;  %v1513_v26 = vpop.f32.mrf.mxu3 }
 0x203   : > { %v1546_v21 = vpop.f32.mrf.mxu0 }
 0x204   : > { %v1570_v22 = vpop.f32.mrf.mxu1  ;;  %1293 = vrot.lane.b32.xlu2 %v1290_v20, %s2479_s14 }
 0x205   : > { %v1571_v24 = vadd.f32 %v1570_v22, %v1546_v21 }
 0x209   : > { %v1379_v23 = vpop.f32.mrf.mxu2  ;;  %v683_v53 = vpop.permute.xlu2 %682 }
 0x20a   : > { %v1404_v25 = vadd.f32 %v1403_v18, %v1379_v23  ;;  %v1627_v30 = vpop.f32.mrf.mxu3 }
 0x20b   : > { %v1660_v27 = vpop.f32.mrf.mxu0 }
 0x20c   : > { %v1684_v28 = vpop.f32.mrf.mxu1  ;;  %1574 = vrot.lane.b32.xlu2 %v1571_v24, %s2477_s12  ;;  %1407 = vrot.lane.b32.xlu0 %v1404_v25, %s2475_s10 }
 0x20d   : > { %v1685_v29 = vadd.f32 %v1684_v28, %v1660_v27 }
 0x20f   : > { %1687 = vst.msk [vmem:[%s2772_s22 + $0x18] sm:$0xf] %vm345_vm3, %v1685_v29 }
 0x211   : > { %v1489_v8 = vpop.f32.mrf.mxu2 }
 0x212   : > { %v1514_v10 = vadd.f32 %v1513_v26, %v1489_v8 }
 0x214   : > { %1517 = vrot.lane.b32.xlu0 %v1514_v10, %s2479_s14  ;;  %v1770_v32 = vpop.f32.mrf.mxu0 }
 0x219   : > { %v1603_v31 = vpop.f32.mrf.mxu2  ;;  %v1737_v9 = vpop.f32.mrf.mxu3 }
 0x21a   : > { %v1628_v51 = vadd.f32 %v1627_v30, %v1603_v31 }
 0x21b   : > { %v1794_v33 = vpop.f32.mrf.mxu1 }
 0x21c   : > { %v1795_v34 = vadd.f32 %v1794_v33, %v1770_v32 }
 0x21e   : > { %1798 = vrot.lane.b32.xlu0 %v1795_v34, %s2477_s12 }
 0x221   : > { %v1713_v35 = vpop.f32.mrf.mxu2  ;;  %v907_v55 = vpop.permute.xlu2 %906 }
 0x222   : > { %v1738_v11 = vadd.f32 %v1737_v9, %v1713_v35  ;;  %v1851_v36 = vpop.f32.mrf.mxu3 }
 0x223   : > { %v1908_v37 = vpop.f32.mrf.mxu1 }
 0x224   : > { %1741 = vrot.lane.b32.xlu1 %v1738_v11, %s2479_s14 }
 0x229   : > { %v1827_v38 = vpop.f32.mrf.mxu2 }
 0x22a   : > { %v1961_v41 = vpop.f32.mrf.mxu3  ;;  %v1852_v48 = vadd.f32 %v1851_v36, %v1827_v38 }
 0x22b   : > { %v1884_v39 = vpop.f32.mrf.mxu0 }
 0x22c   : > { %v1909_v40 = vadd.f32 %v1908_v37, %v1884_v39  ;;  %v2018_v44 = vpop.f32.mrf.mxu1 }
 0x22e   : > { %1911 = vst.msk [vmem:[%s2772_s22 + $0x1c] sm:$0xf] %vm345_vm3, %v1909_v40 }
 0x231   : > { %v1937_v42 = vpop.f32.mrf.mxu2 }
 0x232   : > { %v1962_v43 = vadd.f32 %v1961_v41, %v1937_v42 }
 0x233   : > { %v1994_v45 = vpop.f32.mrf.mxu0 }
 0x234   : > { %v2019_v46 = vadd.f32 %v2018_v44, %v1994_v45  ;;  %1965 = vrot.lane.b32.xlu2 %v1962_v43, %s2479_s14 }
 0x236   : > { %2022 = vrot.lane.b32.xlu1 %v2019_v46, %s2477_s12  ;;  %s2425_s12 = scalar_lea.hbm %s3051_s4, 64 }
 0x237   : > { %p2427_p1 = scmp.lt.s32.totalorder %s2425_s12, %s2421_s9 }
 0x239   : > { %v2051_v47 = vpop.f32.mrf.mxu2  ;;  %p2428_p3 = por %p2427_p1, %p2426_p0 }
 0x23a   : > { %v2075_v49 = vpop.f32.mrf.mxu3 }
 0x23b   : > { %v2076_v50 = vadd.f32 %v2075_v49, %v2051_v47  ;;  %p2429_p4 = pnand %p2428_p3, %p2424_p13 }
 0x23c   : > { %1855 = vrot.lane.b32.xlu2 %v1852_v48, %s2475_s10 }
 0x23d   : > { %2079 = vrot.lane.b32.xlu0 %v2076_v50, %s2475_s10 }
 0x23e   : > { %v515_v52 = vpop.permute.xlu0 %514  ;;  %1631 = vrot.lane.b32.xlu1 %v1628_v51, %s2475_s10 }
 0x23f   : > { %518 = vst.msk [vmem:[%s2772_s22] sm:$0xf] %vm517_vm6, %v515_v52 }
 0x246   : > { %v626_v54 = vpop.permute.xlu1 %625 }
 0x247   : > { %628 = vst.msk [vmem:[%s2772_s22 + $0x4] sm:$0xf] %vm401_vm4, %v626_v54 }
 0x248   : > { %685 = vst.msk [vmem:[%s2772_s22 + $0x4] sm:$0xf] %vm459_vm5, %v683_v53 }
 0x24e   : > { %v740_v56 = vpop.permute.xlu0 %739 }
 0x24f   : > { %742 = vst.msk [vmem:[%s2772_s22 + $0x4] sm:$0xf] %vm517_vm6, %v740_v56 }
 0x256   : > { %v1188_v57 = vpop.permute.xlu2 %1187  ;;  %v850_v58 = vpop.permute.xlu1 %849 }
 0x257   : > { %852 = vst.msk [vmem:[%s2772_s22 + $0x8] sm:$0xf] %vm401_vm4, %v850_v58 }
 0x258   : > { %909 = vst.msk [vmem:[%s2772_s22 + $0x8] sm:$0xf] %vm459_vm5, %v907_v55 }
 0x25e   : > { %v1294_v59 = vpop.permute.xlu2 %1293  ;;  %v964_v60 = vpop.permute.xlu0 %963 }
 0x25f   : > { %1296 = vst.msk [vmem:[%s2772_s22 + $0x10] sm:$0xf] %vm401_vm4, %v1294_v59 }
 0x260   : > { %966 = vst.msk [vmem:[%s2772_s22 + $0x8] sm:$0xf] %vm517_vm6, %v964_v60 }
 0x266   : > { %v1131_v61 = vpop.permute.xlu0 %1130  ;;  %v1074_v62 = vpop.permute.xlu1 %1073 }
 0x267   : > { %1076 = vst.msk [vmem:[%s2772_s22 + $0xc] sm:$0xf] %vm401_vm4, %v1074_v62  ;;  %v1575_v1 = vpop.permute.xlu2 %1574 }
 0x268   : > { %1133 = vst.msk [vmem:[%s2772_s22 + $0xc] sm:$0xf] %vm459_vm5, %v1131_v61 }
 0x269   : > { %1190 = vst.msk [vmem:[%s2772_s22 + $0xc] sm:$0xf] %vm517_vm6, %v1188_v57 }
 0x26e   : > { %v1351_v63 = vpop.permute.xlu1 %1350 }
 0x26f   : > { %1353 = vst.msk [vmem:[%s2772_s22 + $0x10] sm:$0xf] %vm459_vm5, %v1351_v63 }
 0x27e   : > { %v1408_v0 = vpop.permute.xlu0 %1407 }
 0x27f   : > { %1410 = vst.msk [vmem:[%s2772_s22 + $0x10] sm:$0xf] %vm517_vm6, %v1408_v0 }
 0x286   : > { %v1518_v2 = vpop.permute.xlu0 %1517 }
 0x287   : > { %1520 = vst.msk [vmem:[%s2772_s22 + $0x14] sm:$0xf] %vm401_vm4, %v1518_v2 }
 0x288   : > { %1577 = vst.msk [vmem:[%s2772_s22 + $0x14] sm:$0xf] %vm459_vm5, %v1575_v1 }
 0x28e   : > { %v1966_v3 = vpop.permute.xlu2 %1965 }
 0x28f   : > { %1968 = vst.msk [vmem:[%s2772_s22 + $0x1c] sm:$0xf] %vm401_vm4, %v1966_v3 }
 0x290   : > { %v1799_v5 = vpop.permute.xlu0 %1798 }
 0x296   : > { %v1742_v4 = vpop.permute.xlu1 %1741  ;;  %v1856_v6 = vpop.permute.xlu2 %1855 }
 0x297   : > { %1744 = vst.msk [vmem:[%s2772_s22 + $0x18] sm:$0xf] %vm401_vm4, %v1742_v4 }
 0x298   : > { %1801 = vst.msk [vmem:[%s2772_s22 + $0x18] sm:$0xf] %vm459_vm5, %v1799_v5 }
 0x299   : > { %1858 = vst.msk [vmem:[%s2772_s22 + $0x18] sm:$0xf] %vm517_vm6, %v1856_v6 }
 0x2a8   : > { %v2023_v7 = vpop.permute.xlu1 %2022 }
 0x2a9   : > { %2025 = vst.msk [vmem:[%s2772_s22 + $0x1c] sm:$0xf] %vm459_vm5, %v2023_v7 }
 0x2af   : > { %v2080_v12 = vpop.permute.xlu0 %2079 }
 0x2b0   : > { %2082 = vst.msk [vmem:[%s2772_s22 + $0x1c] sm:$0xf] %vm517_vm6, %v2080_v12  ;;  %v1632_v13 = vpop.permute.xlu1 %1631 }
 0x2b1   : > { %1634 = vst.msk [vmem:[%s2772_s22 + $0x14] sm:$0xf] %vm517_vm6, %v1632_v13 }
 0x2b2   : > { %2432 = shalt.err (!%p2429_p4)
}
 0x2b3   : > { %2322 = dma.vmem_to_hbm [thread:$0]  (%p2556_p11), %s2098_s6, 512, %s2100_s7, %s2084_s8  }
 0x2b4 PF: > { %s2111_s29 = sand.u32 1, %s2459_s15   ;;  %p3057_p7 = scmp.ge.s32.totalorder %s2471_s18, 2 }
 0x2b5   : > { %s2112_s26 = scalar_lea.sflag [#allocation4], %s2111_s29 }
 0x2b6   : > { %p2329_p5 = pnand %p3057_p7, %p2560_p12 }
 0x2b8   : > { %p2330_p8 = pneg %p2329_p5 }
 0x2ba   : > { %2454 = dma.done.wait (%p2330_p8), %s2112_s26, 512  }
 0x2bb   : > { %2456 = vsyncadd (%p2330_p8), %s2112_s26, 4294966784  ;;  %p17_p10 = scmp.ge.s32.totalorder %s2531_s21, 4   ;;  %s3058_s15 = smov %s2463_s16 }
 0x2bc   : > { %s3059_s16 = smov %s2467_s17  ;;  %s3060_s17 = smov %s2543_s24 }
 0x2bd   : > { %s3061_s18 = smov %s2531_s21  ;;  %19 = sbr.rel (!%p17_p10) target bundleno = 5 (0x5), region = 82 }
 0x2c2   :  { %2118 = vsyncpa [#allocation3], 1 }
 0x2c3   :  { %2120 = vsyncpa [#allocation3 + $0x1], 1 }
 0x2c4   :  { %2121 = vsyncpa [#allocation4], 1 }
 0x2c5   :  { %2123 = vsyncpa [#allocation4 + $0x1], 1 }

</bundles_post_ra>
